<compile_context>
chip_gen: v7x
topology: tpu7x:2x2x1
jax: 0.10.0
libtpu: 0.0.40
codegen_flags: <defaults>
</compile_context>

<pallas_src>
import functools

import numpy as np
import jax
import jax.numpy as jnp
from jax import lax
from jax.experimental import pallas as pl
from jax.experimental.pallas import tpu as pltpu

LRELU_SLOPE = 0.1
_HALO = 128   # lanes of halo each side of a time tile (keeps the central slice 128-lane
              # aligned); only (K//2)*(d1+d2) <= 4 columns are actually needed.


def _round_up(n, m):
    return ((n + m - 1) // m) * m


def _window_parts(T, TT, P, nT):
    """Statically-sized DMA parts covering [i*TT - P, i*TT + TT + P) clamped to [0, T).

    Each part: (sem_index, buffer_col_offset, width, src_offset_rel_to_i*TT,
    condition(i) or None for 'always').  All widths/offsets are Python ints, so every
    DMA has a static size (no dynamic-length copies); missing regions (left edge of the
    first tile, beyond-T tail) are zeroed in-register via a validity row."""
    TT_last = T - (nT - 1) * TT                  # width of the last (possibly ragged) tile
    parts = []
    if nT > 1:                                   # left halo (tail of the previous tile)
        parts.append((0, 0, P, -P, lambda ii: ii >= 1))
    if TT_last == TT:                            # center
        parts.append((1, P, TT, 0, None))
    else:
        parts.append((1, P, TT, 0, lambda ii: ii < nT - 1))
        parts.append((1, P, TT_last, 0, lambda ii: ii == nT - 1))
    if nT > 1:                                   # right halo (head of the next tile)
        r2 = min(P, TT_last)
        if r2 == P:
            parts.append((2, P + TT, P, TT, lambda ii: ii < nT - 1))
        else:
            if nT > 2:
                parts.append((2, P + TT, P, TT, lambda ii: ii < nT - 2))
            parts.append((2, P + TT, r2, TT, lambda ii: ii == nT - 2))
    return parts


def _resblock2_kernel(*refs, has_mask, T, TT, P, W, d1, d2, K, parts):
    """Fused ResBlock2 forward for one (batch, time-tile) grid step."""
    if has_mask:
        x_hbm, m_ref, w1_ref, b1_ref, w2_ref, b2_ref, out_ref, xbuf, sem = refs
    else:
        x_hbm, w1_ref, b1_ref, w2_ref, b2_ref, out_ref, xbuf, sem = refs
        m_ref = None

    b = pl.program_id(0)
    i = pl.program_id(1)
    nT = pl.num_programs(1)
    slot = i % 2

    # ---------------- manual, double-buffered halo-window DMA ----------------
    def part_copy(part, ii, slot_):
        sem_idx, buf_off, size, src_rel = part[:4]
        start = pl.multiple_of(ii * TT + src_rel, 128)
        return pltpu.make_async_copy(
            x_hbm.at[b, :, pl.ds(start, size)],
            xbuf.at[slot_, :, pl.ds(buf_off, size)],
            sem.at[slot_, sem_idx])

    def run_parts(ii, slot_, action):
        for part in parts:
            cond = part[4]
            if cond is None:
                action(part_copy(part, ii, slot_))
            else:
                @pl.when(cond(ii))
                def _(part=part):
                    action(part_copy(part, ii, slot_))

    # Prime the pipeline at the start of each batch row (the time axis runs
    # sequentially on one core), then prefetch the NEXT tile's window before waiting
    # on the current one so the HBM fetch overlaps this tile's compute.
    @pl.when(i == 0)
    def _():
        run_parts(i, slot, lambda cp: cp.start())

    @pl.when(i + 1 < nT)
    def _():
        run_parts(i + 1, 1 - slot, lambda cp: cp.start())

    run_parts(i, slot, lambda cp: cp.wait())

    # ------------------------------- compute ---------------------------------
    s0 = i * TT
    lane = lax.broadcasted_iota(jnp.int32, (1, W), 1)
    pos = (s0 - P) + lane                                   # global time coordinate
    valid = jnp.logical_and(pos >= 0, pos < T)              # (1, W) row

    # Sanitize un-fetched lanes (left edge of tile 0, beyond-T tail) -> exact conv
    # zero padding and no stale-VMEM garbage.
    x = jnp.where(valid, xbuf[slot], 0.0)                   # (C, W) f32
    if has_mask:
        m = m_ref[:, pl.ds(pl.multiple_of(s0, 128), W)]     # (1, W), zero outside [0, T)

    half = K // 2

    def lrelu(v):
        return jnp.where(v >= 0, v, LRELU_SLOPE * v)

    def dilated_conv(h, w_ref, b_ref, d):
        # One MXU matmul for all K taps: stack h shifted by -half*d .. +half*d on
        # sublanes (XLU roll) and contract against the folded (C, K*C) bf16 weight.
        taps = [h if off == 0 else pltpu.roll(h, shift=(-off) % W, axis=1)
                for off in range(-half * d, half * d + 1, d)]
        taps = jnp.concatenate(taps, axis=0).astype(jnp.bfloat16)       # (K*C, W)
        return jnp.dot(w_ref[...], taps,
                       preferred_element_type=jnp.float32) + b_ref[...]

    # conv 1 (dilation d1) + residual
    xt = lrelu(x)
    if has_mask:
        xt = xt * m
    x = x + dilated_conv(xt, w1_ref, b1_ref, d1)

    # conv 2 (dilation d2) + residual.  Re-zero the conv-padding / tail columns
    # (conv1's bias made them nonzero); with a mask, m is already zero there.
    xt = lrelu(x)
    xt = xt * m if has_mask else jnp.where(valid, xt, 0.0)
    x = x + dilated_conv(xt, w2_ref, b2_ref, d2)

    # Store the halo-free central tile (slice starts at lane P=128 -> aligned view,
    # lane-dense unmasked stores).
    center = x[:, P:P + TT]
    if has_mask:
        center = center * m[:, P:P + TT]
    out_ref[...] = center.astype(out_ref.dtype)


def res_block2(x, w1, b1, w2, b2, dilation=(1, 3), x_mask=None, tile_t=1024):
    """Pallas TPU forward of ResBlock2.

    x: (B, C, T) float; w1/w2: (C, C, K) effective (weight-norm resolved) Conv1d
    weights; b1/b2: (C,); x_mask: optional (B, 1, T)."""
    B, C, T = x.shape
    d1, d2 = int(dilation[0]), int(dilation[1])
    K = int(w1.shape[-1])
    assert w1.shape == (C, C, K) and w2.shape == (C, C, K)
    assert K % 2 == 1, "only odd kernel sizes ('same' padding) are supported"
    P = _HALO
    assert (K // 2) * (d1 + d2) <= P, "halo too small for this kernel/dilation combo"

    TT = max(128, min(_round_up(tile_t, 128), _round_up(T, 128)))   # lane-dense tile
    Tp = _round_up(T, TT)
    nT = Tp // TT
    W = TT + 2 * P
    has_mask = x_mask is not None
    parts = _window_parts(T, TT, P, nT)

    x = x.astype(jnp.float32)
    # Fold the K taps into the contraction dim: wf[co, k*C + ci] = w[co, ci, k].
    # Weights in bf16 (bf16-native MXU), biases / activations / residual stay f32.
    wf1 = jnp.transpose(w1.astype(jnp.float32), (0, 2, 1)).reshape(C, K * C)
    wf2 = jnp.transpose(w2.astype(jnp.float32), (0, 2, 1)).reshape(C, K * C)
    wf1, wf2 = wf1.astype(jnp.bfloat16), wf2.astype(jnp.bfloat16)
    b1c = b1.astype(jnp.float32).reshape(C, 1)
    b2c = b2.astype(jnp.float32).reshape(C, 1)

    inputs = [x]
    in_specs = [pl.BlockSpec(memory_space=pl.ANY)]          # x stays in HBM (manual DMA)
    if has_mask:
        # Tiny (1, T) mask row, zero-padded into window coordinates; VMEM-resident for a
        # whole batch row (index_map constant in the time-tile index).
        m_pad = jnp.pad(jnp.broadcast_to(x_mask.astype(jnp.float32), (B, 1, T)),
                        ((0, 0), (0, 0), (P, P + Tp - T)))
        inputs.append(m_pad)
        in_specs.append(pl.BlockSpec((None, 1, Tp + 2 * P), lambda b, i: (b, 0, 0)))
    inputs += [wf1, b1c, wf2, b2c]
    in_specs += [
        pl.BlockSpec((C, K * C), lambda b, i: (0, 0)),      # wf1: resident in VMEM
        pl.BlockSpec((C, 1), lambda b, i: (0, 0)),          # b1
        pl.BlockSpec((C, K * C), lambda b, i: (0, 0)),      # wf2: resident in VMEM
        pl.BlockSpec((C, 1), lambda b, i: (0, 0)),          # b2
    ]

    kernel = functools.partial(_resblock2_kernel, has_mask=has_mask,
                               T=T, TT=TT, P=P, W=W, d1=d1, d2=d2, K=K, parts=parts)

    # VMEM: double-buffered halo window + auto-double-buffered output tile + resident
    # weights (+ mask row) + matmul temporaries; 2x headroom, capped below v7x's 64 MiB.
    work = (2 * C * W * 4 + 2 * C * TT * 4 + 2 * (C * K * C * 2 + C * 4)
            + (2 * (Tp + 2 * P) * 4 if has_mask else 0)
            + K * C * W * 2 + 4 * C * W * 4)
    vmem_limit = int(min(48 << 20, max(16 << 20, 2 * work)))

    flops = int(2 * 2 * C * (K * C) * W * B * nT)           # two fused-tap matmuls/tile
    bytes_accessed = int(4 * B * C * (T + Tp) + 4 * C * 2 * P * B * nT
                         + 2 * 2 * C * K * C
                         + (4 * B * (Tp + 2 * P) if has_mask else 0))

    out = pl.pallas_call(
        kernel,
        out_shape=jax.ShapeDtypeStruct((B, C, Tp), jnp.float32),
        grid=(B, nT),
        in_specs=in_specs,
        out_specs=pl.BlockSpec((None, C, TT), lambda b, i: (b, 0, i)),
        scratch_shapes=[
            pltpu.VMEM((2, C, W), jnp.float32),             # double-buffered halo window
            pltpu.SemaphoreType.DMA((2, 3)),                # [slot, part]
        ],
        compiler_params=pltpu.CompilerParams(
            dimension_semantics=("parallel", "arbitrary"),
            vmem_limit_bytes=vmem_limit,
        ),
        cost_estimate=pl.CostEstimate(flops=flops, transcendentals=0,
                                      bytes_accessed=bytes_accessed),
    )(*inputs)

    return out if Tp == T else out[:, :, :T]


def _ref_resblock2(x, w1, b1, w2, b2, dilation=(1, 3), x_mask=None):
    """Pure-JAX reference mirroring the PyTorch ResBlock2.forward."""
    def conv(h, w, b, d):
        out = lax.conv_general_dilated(
            h, w, window_strides=(1,), padding=[(d, d)], rhs_dilation=(d,),
            dimension_numbers=("NCH", "OIH", "NCH"),
            precision=lax.Precision.HIGHEST)
        return out + b[None, :, None]

    def lrelu(h):
        return jnp.where(h >= 0, h, LRELU_SLOPE * h)

    for w, b, d in ((w1, b1, dilation[0]), (w2, b2, dilation[1])):
        xt = lrelu(x)
        if x_mask is not None:
            xt = xt * x_mask
        x = conv(xt, w, b, d) + x
    if x_mask is not None:
        x = x * x_mask
    return x


if __name__ == "__main__":
    key = jax.random.PRNGKey(0)
    kx, kw1, kb1, kw2, kb2 = jax.random.split(key, 5)
    B, C, T, K = 2, 32, 384, 3

    x = jax.random.normal(kx, (B, C, T), dtype=jnp.float32)
    # weight_norm(Conv1d) is a reparameterization; the forward only needs the effective
    # weights (init_weights -> N(0, 0.01)).
    w1 = 0.01 * jax.random.normal(kw1, (C, C, K), dtype=jnp.float32)
    b1 = 0.01 * jax.random.normal(kb1, (C,), dtype=jnp.float32)
    w2 = 0.01 * jax.random.normal(kw2, (C, C, K), dtype=jnp.float32)
    b2 = 0.01 * jax.random.normal(kb2, (C,), dtype=jnp.float32)

    lengths = jnp.array([T, T - 57], dtype=jnp.int32)
    x_mask = (jnp.arange(T)[None, :] < lengths[:, None]).astype(jnp.float32)[:, None, :]

    # tile_t=128 -> 3 time tiles per batch: exercises priming, halo fetches and the
    # double-buffered prefetch handshake at small shapes.
    out_plain = res_block2(x, w1, b1, w2, b2, (1, 3), x_mask=None, tile_t=128)
    out_mask = res_block2(x, w1, b1, w2, b2, (1, 3), x_mask=x_mask, tile_t=128)

    # Ragged tail: T not a multiple of the tile (last tile is only 64 wide).
    T2 = 320
    x2, m2 = x[:, :, :T2], x_mask[:, :, :T2]
    out_rag = res_block2(x2, w1, b1, w2, b2, (1, 3), x_mask=m2, tile_t=128)

    out_plain, out_mask, out_rag = jax.block_until_ready((out_plain, out_mask, out_rag))

    ref_plain = _ref_resblock2(x, w1, b1, w2, b2, (1, 3), None)
    ref_mask = _ref_resblock2(x, w1, b1, w2, b2, (1, 3), x_mask)
    ref_rag = _ref_resblock2(x2, w1, b1, w2, b2, (1, 3), m2)

    tol = dict(rtol=5e-3, atol=5e-3)    # bf16 matmul operands, f32 accumulation
    np.testing.assert_allclose(np.asarray(out_plain), np.asarray(ref_plain), **tol)
    np.testing.assert_allclose(np.asarray(out_mask), np.asarray(ref_mask), **tol)
    np.testing.assert_allclose(np.asarray(out_rag), np.asarray(ref_rag), **tol)
    print("KERNEL_OK")
</pallas_src>

<mosaic_0001>
module attributes {stable_mosaic.version = 11 : i64} {
  func.func @_resblock2_kernel(%arg0: i32, %arg1: i32, %arg2: memref<2x32x384xf32, #tpu.memory_space<any>>, %arg3: memref<32x96xbf16, #tpu.memory_space<vmem>>, %arg4: memref<32x1xf32, #tpu.memory_space<vmem>>, %arg5: memref<32x96xbf16, #tpu.memory_space<vmem>>, %arg6: memref<32x1xf32, #tpu.memory_space<vmem>>, %arg7: memref<1x32x128xf32, #tpu.memory_space<vmem>>, %arg8: memref<2x32x384xf32, #tpu.memory_space<vmem>>, %arg9: memref<2x3x!tpu.dma_semaphore, #tpu.memory_space<semaphore_mem>>) attributes {dimension_semantics = [#tpu.dimension_semantics<parallel>, #tpu.dimension_semantics<arbitrary>], iteration_bounds = array<i64: 2, 3>, scalar_prefetch = 0 : i64, scratch_operands = 2 : i64, tpu.core_type = #tpu.core_type<tc>, window_params = [{}, {pipeline_mode = #tpu.pipeline_mode<synchronous>, transform_indices = @transform_1, window_bounds = array<i64: 32, 96>}, {pipeline_mode = #tpu.pipeline_mode<synchronous>, transform_indices = @transform_2, window_bounds = array<i64: 32, 1>}, {pipeline_mode = #tpu.pipeline_mode<synchronous>, transform_indices = @transform_3, window_bounds = array<i64: 32, 96>}, {pipeline_mode = #tpu.pipeline_mode<synchronous>, transform_indices = @transform_4, window_bounds = array<i64: 32, 1>}, {transform_indices = @transform_5, window_bounds = array<i64: 1, 32, 128>}]} {
    %c2_i32 = arith.constant 2 : i32
    %c0_i32 = arith.constant 0 : i32
    %0 = arith.cmpi eq, %c2_i32, %c0_i32 : i32
    %c1_i32 = arith.constant 1 : i32
    %1 = arith.select %0, %c1_i32, %c2_i32 : i32
    %2 = arith.remsi %arg1, %1 : i32
    %c0_i32_0 = arith.constant 0 : i32
    %3 = arith.cmpi ne, %2, %c0_i32_0 : i32
    %c0_i32_1 = arith.constant 0 : i32
    %4 = arith.cmpi slt, %2, %c0_i32_1 : i32
    %c0_i32_2 = arith.constant 0 : i32
    %5 = arith.cmpi slt, %1, %c0_i32_2 : i32
    %6 = arith.xori %4, %5 : i1
    %7 = arith.andi %6, %3 : i1
    %8 = arith.addi %2, %1 : i32
    %9 = arith.select %7, %8, %2 : i32
    %c0_i32_3 = arith.constant 0 : i32
    %10 = arith.cmpi eq, %arg1, %c0_i32_3 : i32
    %11 = arith.extui %10 : i1 to i32
    %c0_i32_4 = arith.constant 0 : i32
    %12 = arith.cmpi ne, %11, %c0_i32_4 : i32
    scf.if %12 {
      %c1_i32_40 = arith.constant 1 : i32
      %87 = arith.cmpi sge, %arg1, %c1_i32_40 : i32
      %88 = arith.extui %87 : i1 to i32
      %c0_i32_41 = arith.constant 0 : i32
      %89 = arith.cmpi ne, %88, %c0_i32_41 : i32
      scf.if %89 {
        %c128_i32_50 = arith.constant 128 : i32
        %102 = arith.muli %arg1, %c128_i32_50 : i32
        %c-128_i32 = arith.constant -128 : i32
        %103 = arith.addi %102, %c-128_i32 : i32
        %104 = tpu.assume_multiple %103, 128 : i32
        %c0_i32_51 = arith.constant 0 : i32
        %c0_i32_52 = arith.constant 0 : i32
        %105 = tpu.memref_slice %arg2[%arg0, %c0_i32_52, %104] : memref<2x32x384xf32, #tpu.memory_space<any>> -> memref<1x32x128xf32, #tpu.memory_space<any>>
        %106 = tpu.memref_squeeze %105 : memref<1x32x128xf32, #tpu.memory_space<any>> -> memref<32x128xf32, #tpu.memory_space<any>>
        %c0_i32_53 = arith.constant 0 : i32
        %c0_i32_54 = arith.constant 0 : i32
        %107 = tpu.memref_slice %arg8[%9, %c0_i32_53, %c0_i32_54] : memref<2x32x384xf32, #tpu.memory_space<vmem>> -> memref<1x32x128xf32, #tpu.memory_space<vmem>>
        %108 = tpu.memref_squeeze %107 : memref<1x32x128xf32, #tpu.memory_space<vmem>> -> memref<32x128xf32, #tpu.memory_space<vmem>>
        %109 = tpu.memref_slice %arg9[%9, %c0_i32_51] : memref<2x3x!tpu.dma_semaphore, #tpu.memory_space<semaphore_mem>> -> memref<1x1x!tpu.dma_semaphore, #tpu.memory_space<semaphore_mem>>
        %110 = tpu.memref_squeeze %109 : memref<1x1x!tpu.dma_semaphore, #tpu.memory_space<semaphore_mem>> -> memref<!tpu.dma_semaphore, #tpu.memory_space<semaphore_mem>>
        tpu.enqueue_dma source(%106 : memref<32x128xf32, #tpu.memory_space<any>>) target(%108 : memref<32x128xf32, #tpu.memory_space<vmem>>) target_semaphore(%110 : memref<!tpu.dma_semaphore, #tpu.memory_space<semaphore_mem>>)
      } else {
      }
      %c128_i32_42 = arith.constant 128 : i32
      %90 = arith.muli %arg1, %c128_i32_42 : i32
      %c0_i32_43 = arith.constant 0 : i32
      %91 = arith.addi %90, %c0_i32_43 : i32
      %92 = tpu.assume_multiple %91, 128 : i32
      %c1_i32_44 = arith.constant 1 : i32
      %c0_i32_45 = arith.constant 0 : i32
      %93 = tpu.memref_slice %arg2[%arg0, %c0_i32_45, %92] : memref<2x32x384xf32, #tpu.memory_space<any>> -> memref<1x32x128xf32, #tpu.memory_space<any>>
      %94 = tpu.memref_squeeze %93 : memref<1x32x128xf32, #tpu.memory_space<any>> -> memref<32x128xf32, #tpu.memory_space<any>>
      %c0_i32_46 = arith.constant 0 : i32
      %c128_i32_47 = arith.constant 128 : i32
      %95 = tpu.memref_slice %arg8[%9, %c0_i32_46, %c128_i32_47] : memref<2x32x384xf32, #tpu.memory_space<vmem>> -> memref<1x32x128xf32, #tpu.memory_space<vmem>>
      %96 = tpu.memref_squeeze %95 : memref<1x32x128xf32, #tpu.memory_space<vmem>> -> memref<32x128xf32, #tpu.memory_space<vmem>>
      %97 = tpu.memref_slice %arg9[%9, %c1_i32_44] : memref<2x3x!tpu.dma_semaphore, #tpu.memory_space<semaphore_mem>> -> memref<1x1x!tpu.dma_semaphore, #tpu.memory_space<semaphore_mem>>
      %98 = tpu.memref_squeeze %97 : memref<1x1x!tpu.dma_semaphore, #tpu.memory_space<semaphore_mem>> -> memref<!tpu.dma_semaphore, #tpu.memory_space<semaphore_mem>>
      tpu.enqueue_dma source(%94 : memref<32x128xf32, #tpu.memory_space<any>>) target(%96 : memref<32x128xf32, #tpu.memory_space<vmem>>) target_semaphore(%98 : memref<!tpu.dma_semaphore, #tpu.memory_space<semaphore_mem>>)
      %c2_i32_48 = arith.constant 2 : i32
      %99 = arith.cmpi slt, %arg1, %c2_i32_48 : i32
      %100 = arith.extui %99 : i1 to i32
      %c0_i32_49 = arith.constant 0 : i32
      %101 = arith.cmpi ne, %100, %c0_i32_49 : i32
      scf.if %101 {
        %c128_i32_50 = arith.constant 128 : i32
        %102 = arith.muli %arg1, %c128_i32_50 : i32
        %c128_i32_51 = arith.constant 128 : i32
        %103 = arith.addi %102, %c128_i32_51 : i32
        %104 = tpu.assume_multiple %103, 128 : i32
        %c2_i32_52 = arith.constant 2 : i32
        %c0_i32_53 = arith.constant 0 : i32
        %105 = tpu.memref_slice %arg2[%arg0, %c0_i32_53, %104] : memref<2x32x384xf32, #tpu.memory_space<any>> -> memref<1x32x128xf32, #tpu.memory_space<any>>
        %106 = tpu.memref_squeeze %105 : memref<1x32x128xf32, #tpu.memory_space<any>> -> memref<32x128xf32, #tpu.memory_space<any>>
        %c0_i32_54 = arith.constant 0 : i32
        %c256_i32 = arith.constant 256 : i32
        %107 = tpu.memref_slice %arg8[%9, %c0_i32_54, %c256_i32] : memref<2x32x384xf32, #tpu.memory_space<vmem>> -> memref<1x32x128xf32, #tpu.memory_space<vmem>>
        %108 = tpu.memref_squeeze %107 : memref<1x32x128xf32, #tpu.memory_space<vmem>> -> memref<32x128xf32, #tpu.memory_space<vmem>>
        %109 = tpu.memref_slice %arg9[%9, %c2_i32_52] : memref<2x3x!tpu.dma_semaphore, #tpu.memory_space<semaphore_mem>> -> memref<1x1x!tpu.dma_semaphore, #tpu.memory_space<semaphore_mem>>
        %110 = tpu.memref_squeeze %109 : memref<1x1x!tpu.dma_semaphore, #tpu.memory_space<semaphore_mem>> -> memref<!tpu.dma_semaphore, #tpu.memory_space<semaphore_mem>>
        tpu.enqueue_dma source(%106 : memref<32x128xf32, #tpu.memory_space<any>>) target(%108 : memref<32x128xf32, #tpu.memory_space<vmem>>) target_semaphore(%110 : memref<!tpu.dma_semaphore, #tpu.memory_space<semaphore_mem>>)
      } else {
      }
    } else {
    }
    %c1_i32_5 = arith.constant 1 : i32
    %13 = arith.addi %arg1, %c1_i32_5 : i32
    %c3_i32 = arith.constant 3 : i32
    %14 = arith.cmpi slt, %13, %c3_i32 : i32
    %15 = arith.extui %14 : i1 to i32
    %c0_i32_6 = arith.constant 0 : i32
    %16 = arith.cmpi ne, %15, %c0_i32_6 : i32
    scf.if %16 {
      %c1_i32_40 = arith.constant 1 : i32
      %87 = arith.addi %arg1, %c1_i32_40 : i32
      %c1_i32_41 = arith.constant 1 : i32
      %88 = arith.subi %c1_i32_41, %9 : i32
      %c1_i32_42 = arith.constant 1 : i32
      %89 = arith.cmpi sge, %87, %c1_i32_42 : i32
      %90 = arith.extui %89 : i1 to i32
      %c0_i32_43 = arith.constant 0 : i32
      %91 = arith.cmpi ne, %90, %c0_i32_43 : i32
      scf.if %91 {
        %c128_i32_52 = arith.constant 128 : i32
        %104 = arith.muli %87, %c128_i32_52 : i32
        %c-128_i32 = arith.constant -128 : i32
        %105 = arith.addi %104, %c-128_i32 : i32
        %106 = tpu.assume_multiple %105, 128 : i32
        %c0_i32_53 = arith.constant 0 : i32
        %c0_i32_54 = arith.constant 0 : i32
        %107 = tpu.memref_slice %arg2[%arg0, %c0_i32_54, %106] : memref<2x32x384xf32, #tpu.memory_space<any>> -> memref<1x32x128xf32, #tpu.memory_space<any>>
        %108 = tpu.memref_squeeze %107 : memref<1x32x128xf32, #tpu.memory_space<any>> -> memref<32x128xf32, #tpu.memory_space<any>>
        %c0_i32_55 = arith.constant 0 : i32
        %c0_i32_56 = arith.constant 0 : i32
        %109 = tpu.memref_slice %arg8[%88, %c0_i32_55, %c0_i32_56] : memref<2x32x384xf32, #tpu.memory_space<vmem>> -> memref<1x32x128xf32, #tpu.memory_space<vmem>>
        %110 = tpu.memref_squeeze %109 : memref<1x32x128xf32, #tpu.memory_space<vmem>> -> memref<32x128xf32, #tpu.memory_space<vmem>>
        %111 = tpu.memref_slice %arg9[%88, %c0_i32_53] : memref<2x3x!tpu.dma_semaphore, #tpu.memory_space<semaphore_mem>> -> memref<1x1x!tpu.dma_semaphore, #tpu.memory_space<semaphore_mem>>
        %112 = tpu.memref_squeeze %111 : memref<1x1x!tpu.dma_semaphore, #tpu.memory_space<semaphore_mem>> -> memref<!tpu.dma_semaphore, #tpu.memory_space<semaphore_mem>>
        tpu.enqueue_dma source(%108 : memref<32x128xf32, #tpu.memory_space<any>>) target(%110 : memref<32x128xf32, #tpu.memory_space<vmem>>) target_semaphore(%112 : memref<!tpu.dma_semaphore, #tpu.memory_space<semaphore_mem>>)
      } else {
      }
      %c128_i32_44 = arith.constant 128 : i32
      %92 = arith.muli %87, %c128_i32_44 : i32
      %c0_i32_45 = arith.constant 0 : i32
      %93 = arith.addi %92, %c0_i32_45 : i32
      %94 = tpu.assume_multiple %93, 128 : i32
      %c1_i32_46 = arith.constant 1 : i32
      %c0_i32_47 = arith.constant 0 : i32
      %95 = tpu.memref_slice %arg2[%arg0, %c0_i32_47, %94] : memref<2x32x384xf32, #tpu.memory_space<any>> -> memref<1x32x128xf32, #tpu.memory_space<any>>
      %96 = tpu.memref_squeeze %95 : memref<1x32x128xf32, #tpu.memory_space<any>> -> memref<32x128xf32, #tpu.memory_space<any>>
      %c0_i32_48 = arith.constant 0 : i32
      %c128_i32_49 = arith.constant 128 : i32
      %97 = tpu.memref_slice %arg8[%88, %c0_i32_48, %c128_i32_49] : memref<2x32x384xf32, #tpu.memory_space<vmem>> -> memref<1x32x128xf32, #tpu.memory_space<vmem>>
      %98 = tpu.memref_squeeze %97 : memref<1x32x128xf32, #tpu.memory_space<vmem>> -> memref<32x128xf32, #tpu.memory_space<vmem>>
      %99 = tpu.memref_slice %arg9[%88, %c1_i32_46] : memref<2x3x!tpu.dma_semaphore, #tpu.memory_space<semaphore_mem>> -> memref<1x1x!tpu.dma_semaphore, #tpu.memory_space<semaphore_mem>>
      %100 = tpu.memref_squeeze %99 : memref<1x1x!tpu.dma_semaphore, #tpu.memory_space<semaphore_mem>> -> memref<!tpu.dma_semaphore, #tpu.memory_space<semaphore_mem>>
      tpu.enqueue_dma source(%96 : memref<32x128xf32, #tpu.memory_space<any>>) target(%98 : memref<32x128xf32, #tpu.memory_space<vmem>>) target_semaphore(%100 : memref<!tpu.dma_semaphore, #tpu.memory_space<semaphore_mem>>)
      %c2_i32_50 = arith.constant 2 : i32
      %101 = arith.cmpi slt, %87, %c2_i32_50 : i32
      %102 = arith.extui %101 : i1 to i32
      %c0_i32_51 = arith.constant 0 : i32
      %103 = arith.cmpi ne, %102, %c0_i32_51 : i32
      scf.if %103 {
        %c128_i32_52 = arith.constant 128 : i32
        %104 = arith.muli %87, %c128_i32_52 : i32
        %c128_i32_53 = arith.constant 128 : i32
        %105 = arith.addi %104, %c128_i32_53 : i32
        %106 = tpu.assume_multiple %105, 128 : i32
        %c2_i32_54 = arith.constant 2 : i32
        %c0_i32_55 = arith.constant 0 : i32
        %107 = tpu.memref_slice %arg2[%arg0, %c0_i32_55, %106] : memref<2x32x384xf32, #tpu.memory_space<any>> -> memref<1x32x128xf32, #tpu.memory_space<any>>
        %108 = tpu.memref_squeeze %107 : memref<1x32x128xf32, #tpu.memory_space<any>> -> memref<32x128xf32, #tpu.memory_space<any>>
        %c0_i32_56 = arith.constant 0 : i32
        %c256_i32 = arith.constant 256 : i32
        %109 = tpu.memref_slice %arg8[%88, %c0_i32_56, %c256_i32] : memref<2x32x384xf32, #tpu.memory_space<vmem>> -> memref<1x32x128xf32, #tpu.memory_space<vmem>>
        %110 = tpu.memref_squeeze %109 : memref<1x32x128xf32, #tpu.memory_space<vmem>> -> memref<32x128xf32, #tpu.memory_space<vmem>>
        %111 = tpu.memref_slice %arg9[%88, %c2_i32_54] : memref<2x3x!tpu.dma_semaphore, #tpu.memory_space<semaphore_mem>> -> memref<1x1x!tpu.dma_semaphore, #tpu.memory_space<semaphore_mem>>
        %112 = tpu.memref_squeeze %111 : memref<1x1x!tpu.dma_semaphore, #tpu.memory_space<semaphore_mem>> -> memref<!tpu.dma_semaphore, #tpu.memory_space<semaphore_mem>>
        tpu.enqueue_dma source(%108 : memref<32x128xf32, #tpu.memory_space<any>>) target(%110 : memref<32x128xf32, #tpu.memory_space<vmem>>) target_semaphore(%112 : memref<!tpu.dma_semaphore, #tpu.memory_space<semaphore_mem>>)
      } else {
      }
    } else {
    }
    %c1_i32_7 = arith.constant 1 : i32
    %17 = arith.cmpi sge, %arg1, %c1_i32_7 : i32
    %18 = arith.extui %17 : i1 to i32
    %c0_i32_8 = arith.constant 0 : i32
    %19 = arith.cmpi ne, %18, %c0_i32_8 : i32
    scf.if %19 {
      %c128_i32_40 = arith.constant 128 : i32
      %87 = arith.muli %arg1, %c128_i32_40 : i32
      %c-128_i32 = arith.constant -128 : i32
      %88 = arith.addi %87, %c-128_i32 : i32
      %89 = tpu.assume_multiple %88, 128 : i32
      %c0_i32_41 = arith.constant 0 : i32
      %c0_i32_42 = arith.constant 0 : i32
      %90 = tpu.memref_slice %arg2[%arg0, %c0_i32_42, %89] : memref<2x32x384xf32, #tpu.memory_space<any>> -> memref<1x32x128xf32, #tpu.memory_space<any>>
      %91 = tpu.memref_squeeze %90 : memref<1x32x128xf32, #tpu.memory_space<any>> -> memref<32x128xf32, #tpu.memory_space<any>>
      %c0_i32_43 = arith.constant 0 : i32
      %c0_i32_44 = arith.constant 0 : i32
      %92 = tpu.memref_slice %arg8[%9, %c0_i32_43, %c0_i32_44] : memref<2x32x384xf32, #tpu.memory_space<vmem>> -> memref<1x32x128xf32, #tpu.memory_space<vmem>>
      %93 = tpu.memref_squeeze %92 : memref<1x32x128xf32, #tpu.memory_space<vmem>> -> memref<32x128xf32, #tpu.memory_space<vmem>>
      %94 = tpu.memref_slice %arg9[%9, %c0_i32_41] : memref<2x3x!tpu.dma_semaphore, #tpu.memory_space<semaphore_mem>> -> memref<1x1x!tpu.dma_semaphore, #tpu.memory_space<semaphore_mem>>
      %95 = tpu.memref_squeeze %94 : memref<1x1x!tpu.dma_semaphore, #tpu.memory_space<semaphore_mem>> -> memref<!tpu.dma_semaphore, #tpu.memory_space<semaphore_mem>>
      tpu.wait_dma2 semaphore(%95 : memref<!tpu.dma_semaphore, #tpu.memory_space<semaphore_mem>>) src(%91 : memref<32x128xf32, #tpu.memory_space<any>>) dst(%93 : memref<32x128xf32, #tpu.memory_space<vmem>>)
    } else {
    }
    %c128_i32 = arith.constant 128 : i32
    %20 = arith.muli %arg1, %c128_i32 : i32
    %c0_i32_9 = arith.constant 0 : i32
    %21 = arith.addi %20, %c0_i32_9 : i32
    %22 = tpu.assume_multiple %21, 128 : i32
    %c1_i32_10 = arith.constant 1 : i32
    %c0_i32_11 = arith.constant 0 : i32
    %23 = tpu.memref_slice %arg2[%arg0, %c0_i32_11, %22] : memref<2x32x384xf32, #tpu.memory_space<any>> -> memref<1x32x128xf32, #tpu.memory_space<any>>
    %24 = tpu.memref_squeeze %23 : memref<1x32x128xf32, #tpu.memory_space<any>> -> memref<32x128xf32, #tpu.memory_space<any>>
    %c0_i32_12 = arith.constant 0 : i32
    %c128_i32_13 = arith.constant 128 : i32
    %25 = tpu.memref_slice %arg8[%9, %c0_i32_12, %c128_i32_13] : memref<2x32x384xf32, #tpu.memory_space<vmem>> -> memref<1x32x128xf32, #tpu.memory_space<vmem>>
    %26 = tpu.memref_squeeze %25 : memref<1x32x128xf32, #tpu.memory_space<vmem>> -> memref<32x128xf32, #tpu.memory_space<vmem>>
    %27 = tpu.memref_slice %arg9[%9, %c1_i32_10] : memref<2x3x!tpu.dma_semaphore, #tpu.memory_space<semaphore_mem>> -> memref<1x1x!tpu.dma_semaphore, #tpu.memory_space<semaphore_mem>>
    %28 = tpu.memref_squeeze %27 : memref<1x1x!tpu.dma_semaphore, #tpu.memory_space<semaphore_mem>> -> memref<!tpu.dma_semaphore, #tpu.memory_space<semaphore_mem>>
    tpu.wait_dma2 semaphore(%28 : memref<!tpu.dma_semaphore, #tpu.memory_space<semaphore_mem>>) src(%24 : memref<32x128xf32, #tpu.memory_space<any>>) dst(%26 : memref<32x128xf32, #tpu.memory_space<vmem>>)
    %c2_i32_14 = arith.constant 2 : i32
    %29 = arith.cmpi slt, %arg1, %c2_i32_14 : i32
    %30 = arith.extui %29 : i1 to i32
    %c0_i32_15 = arith.constant 0 : i32
    %31 = arith.cmpi ne, %30, %c0_i32_15 : i32
    scf.if %31 {
      %c128_i32_40 = arith.constant 128 : i32
      %87 = arith.muli %arg1, %c128_i32_40 : i32
      %c128_i32_41 = arith.constant 128 : i32
      %88 = arith.addi %87, %c128_i32_41 : i32
      %89 = tpu.assume_multiple %88, 128 : i32
      %c2_i32_42 = arith.constant 2 : i32
      %c0_i32_43 = arith.constant 0 : i32
      %90 = tpu.memref_slice %arg2[%arg0, %c0_i32_43, %89] : memref<2x32x384xf32, #tpu.memory_space<any>> -> memref<1x32x128xf32, #tpu.memory_space<any>>
      %91 = tpu.memref_squeeze %90 : memref<1x32x128xf32, #tpu.memory_space<any>> -> memref<32x128xf32, #tpu.memory_space<any>>
      %c0_i32_44 = arith.constant 0 : i32
      %c256_i32 = arith.constant 256 : i32
      %92 = tpu.memref_slice %arg8[%9, %c0_i32_44, %c256_i32] : memref<2x32x384xf32, #tpu.memory_space<vmem>> -> memref<1x32x128xf32, #tpu.memory_space<vmem>>
      %93 = tpu.memref_squeeze %92 : memref<1x32x128xf32, #tpu.memory_space<vmem>> -> memref<32x128xf32, #tpu.memory_space<vmem>>
      %94 = tpu.memref_slice %arg9[%9, %c2_i32_42] : memref<2x3x!tpu.dma_semaphore, #tpu.memory_space<semaphore_mem>> -> memref<1x1x!tpu.dma_semaphore, #tpu.memory_space<semaphore_mem>>
      %95 = tpu.memref_squeeze %94 : memref<1x1x!tpu.dma_semaphore, #tpu.memory_space<semaphore_mem>> -> memref<!tpu.dma_semaphore, #tpu.memory_space<semaphore_mem>>
      tpu.wait_dma2 semaphore(%95 : memref<!tpu.dma_semaphore, #tpu.memory_space<semaphore_mem>>) src(%91 : memref<32x128xf32, #tpu.memory_space<any>>) dst(%93 : memref<32x128xf32, #tpu.memory_space<vmem>>)
    } else {
    }
    %c128_i32_16 = arith.constant 128 : i32
    %32 = arith.muli %arg1, %c128_i32_16 : i32
    %33 = tpu.iota {dimensions = array<i32: 1>} : vector<1x384xi32>
    %c128_i32_17 = arith.constant 128 : i32
    %34 = arith.subi %32, %c128_i32_17 : i32
    %35 = vector.broadcast %34 : i32 to vector<1x384xi32>
    %36 = arith.addi %35, %33 : vector<1x384xi32>
    %c0_i32_18 = arith.constant 0 : i32
    %37 = vector.broadcast %c0_i32_18 : i32 to vector<1x384xi32>
    %38 = arith.cmpi sge, %36, %37 : vector<1x384xi32>
    %c384_i32 = arith.constant 384 : i32
    %39 = vector.broadcast %c384_i32 : i32 to vector<1x384xi32>
    %40 = arith.cmpi slt, %36, %39 : vector<1x384xi32>
    %41 = arith.andi %38, %40 : vector<1x384xi1>
    %42 = arith.index_cast %9 : i32 to index
    %c0 = arith.constant 0 : index
    %c0_19 = arith.constant 0 : index
    %43 = vector.load %arg8[%42, %c0, %c0_19] : memref<2x32x384xf32, #tpu.memory_space<vmem>>, vector<1x32x384xf32>
    %44 = vector.shape_cast %43 : vector<1x32x384xf32> to vector<32x384xf32>
    %cst = arith.constant 0.000000e+00 : f32
    %45 = vector.shape_cast %41 : vector<1x384xi1> to vector<1x384xi1>
    %46 = vector.broadcast %45 : vector<1x384xi1> to vector<32x384xi1>
    %47 = vector.broadcast %cst : f32 to vector<32x384xf32>
    %48 = arith.select %46, %44, %47 : vector<32x384xi1>, vector<32x384xf32>
    %cst_20 = arith.constant 0.000000e+00 : f32
    %49 = vector.broadcast %cst_20 : f32 to vector<32x384xf32>
    %50 = arith.cmpf oge, %48, %49 : vector<32x384xf32>
    %cst_21 = arith.constant 1.000000e-01 : f32
    %51 = vector.broadcast %cst_21 : f32 to vector<32x384xf32>
    %52 = arith.mulf %51, %48 : vector<32x384xf32>
    %53 = arith.select %50, %48, %52 : vector<32x384xi1>, vector<32x384xf32>
    %c1_i32_22 = arith.constant 1 : i32
    %54 = tpu.dynamic_rotate %53 by %c1_i32_22 dim 1 : vector<32x384xf32>, i32 -> vector<32x384xf32>
    %c383_i32 = arith.constant 383 : i32
    %55 = tpu.dynamic_rotate %53 by %c383_i32 dim 1 : vector<32x384xf32>, i32 -> vector<32x384xf32>
    %56 = tpu.concatenate %54, %53, %55 in 0 : vector<32x384xf32>, vector<32x384xf32>, vector<32x384xf32> -> vector<96x384xf32>
    %57 = arith.truncf %56 : vector<96x384xf32> to vector<96x384xbf16>
    %c0_23 = arith.constant 0 : index
    %c0_24 = arith.constant 0 : index
    %58 = vector.load %arg3[%c0_23, %c0_24] : memref<32x96xbf16, #tpu.memory_space<vmem>>, vector<32x96xbf16>
    %cst_25 = arith.constant dense<0.000000e+00> : vector<32x384xf32>
    %59 = tpu.matmul %58, %57, %cst_25 {dimension_numbers = #tpu.dot_dimension_numbers<[1], [0], [0], [1], [0, 0, 1, 1], [], []>} : vector<32x96xbf16>, vector<96x384xbf16>, vector<32x384xf32> -> vector<32x384xf32>
    %c0_26 = arith.constant 0 : index
    %c0_27 = arith.constant 0 : index
    %60 = vector.load %arg4[%c0_26, %c0_27] : memref<32x1xf32, #tpu.memory_space<vmem>>, vector<32x1xf32>
    %61 = vector.broadcast %60 : vector<32x1xf32> to vector<32x384xf32>
    %62 = arith.addf %59, %61 : vector<32x384xf32>
    %63 = arith.addf %48, %62 : vector<32x384xf32>
    %cst_28 = arith.constant 0.000000e+00 : f32
    %64 = vector.broadcast %cst_28 : f32 to vector<32x384xf32>
    %65 = arith.cmpf oge, %63, %64 : vector<32x384xf32>
    %cst_29 = arith.constant 1.000000e-01 : f32
    %66 = vector.broadcast %cst_29 : f32 to vector<32x384xf32>
    %67 = arith.mulf %66, %63 : vector<32x384xf32>
    %68 = arith.select %65, %63, %67 : vector<32x384xi1>, vector<32x384xf32>
    %cst_30 = arith.constant 0.000000e+00 : f32
    %69 = vector.shape_cast %41 : vector<1x384xi1> to vector<1x384xi1>
    %70 = vector.broadcast %69 : vector<1x384xi1> to vector<32x384xi1>
    %71 = vector.broadcast %cst_30 : f32 to vector<32x384xf32>
    %72 = arith.select %70, %68, %71 : vector<32x384xi1>, vector<32x384xf32>
    %c3_i32_31 = arith.constant 3 : i32
    %73 = tpu.dynamic_rotate %72 by %c3_i32_31 dim 1 : vector<32x384xf32>, i32 -> vector<32x384xf32>
    %c381_i32 = arith.constant 381 : i32
    %74 = tpu.dynamic_rotate %72 by %c381_i32 dim 1 : vector<32x384xf32>, i32 -> vector<32x384xf32>
    %75 = tpu.concatenate %73, %72, %74 in 0 : vector<32x384xf32>, vector<32x384xf32>, vector<32x384xf32> -> vector<96x384xf32>
    %76 = arith.truncf %75 : vector<96x384xf32> to vector<96x384xbf16>
    %c0_32 = arith.constant 0 : index
    %c0_33 = arith.constant 0 : index
    %77 = vector.load %arg5[%c0_32, %c0_33] : memref<32x96xbf16, #tpu.memory_space<vmem>>, vector<32x96xbf16>
    %cst_34 = arith.constant dense<0.000000e+00> : vector<32x384xf32>
    %78 = tpu.matmul %77, %76, %cst_34 {dimension_numbers = #tpu.dot_dimension_numbers<[1], [0], [0], [1], [0, 0, 1, 1], [], []>} : vector<32x96xbf16>, vector<96x384xbf16>, vector<32x384xf32> -> vector<32x384xf32>
    %c0_35 = arith.constant 0 : index
    %c0_36 = arith.constant 0 : index
    %79 = vector.load %arg6[%c0_35, %c0_36] : memref<32x1xf32, #tpu.memory_space<vmem>>, vector<32x1xf32>
    %80 = vector.broadcast %79 : vector<32x1xf32> to vector<32x384xf32>
    %81 = arith.addf %78, %80 : vector<32x384xf32>
    %82 = arith.addf %63, %81 : vector<32x384xf32>
    %83 = vector.extract_strided_slice %82 {offsets = [0, 128], sizes = [32, 128], strides = [1, 1]} : vector<32x384xf32> to vector<32x128xf32>
    %c0_37 = arith.constant 0 : index
    %c0_38 = arith.constant 0 : index
    %c0_39 = arith.constant 0 : index
    %84 = vector.load %arg7[%c0_37, %c0_38, %c0_39] : memref<1x32x128xf32, #tpu.memory_space<vmem>>, vector<1x32x128xf32>
    %85 = vector.shape_cast %84 : vector<1x32x128xf32> to vector<32x128xf32>
    %86 = vector.shape_cast %83 : vector<32x128xf32> to vector<1x32x128xf32>
    tpu.vector_store %arg7[%c0_37, %c0_38, %c0_39], %86 {strides = array<i32>} : memref<1x32x128xf32, #tpu.memory_space<vmem>>, vector<1x32x128xf32>,
    return
  }
  func.func @transform_1(%arg0: i32, %arg1: i32) -> (i32, i32) {
    %c0_i32 = arith.constant 0 : i32
    %c0_i32_0 = arith.constant 0 : i32
    %c0_i32_1 = arith.constant 0 : i32
    return %c0_i32, %c0_i32_0 : i32, i32
  }
  func.func @transform_2(%arg0: i32, %arg1: i32) -> (i32, i32) {
    %c0_i32 = arith.constant 0 : i32
    %c0_i32_0 = arith.constant 0 : i32
    %c0_i32_1 = arith.constant 0 : i32
    return %c0_i32, %c0_i32_0 : i32, i32
  }
  func.func @transform_3(%arg0: i32, %arg1: i32) -> (i32, i32) {
    %c0_i32 = arith.constant 0 : i32
    %c0_i32_0 = arith.constant 0 : i32
    %c0_i32_1 = arith.constant 0 : i32
    return %c0_i32, %c0_i32_0 : i32, i32
  }
  func.func @transform_4(%arg0: i32, %arg1: i32) -> (i32, i32) {
    %c0_i32 = arith.constant 0 : i32
    %c0_i32_0 = arith.constant 0 : i32
    %c0_i32_1 = arith.constant 0 : i32
    return %c0_i32, %c0_i32_0 : i32, i32
  }
  func.func @transform_5(%arg0: i32, %arg1: i32) -> (i32, i32, i32) {
    %c0_i32 = arith.constant 0 : i32
    %c0_i32_0 = arith.constant 0 : i32
    return %arg0, %c0_i32, %arg1 : i32, i32, i32
  }
}

</mosaic_0001>

<bundles_post_ra>
// kernel: tpu_custom_call.1
= control target key start
LH: loop header
LB: loop body
LE: loop exit
PB: predicated region body
PF: predicated region fallthrough
CT: control target
= control target key end

     0   :  { %s2700_s0 = inlined_call_operand.hbm [shape: f32[2,32,384], index: 0, kind: input, shape index: {}]   ;;  %s2701_s1 = inlined_call_operand.vmem [shape: bf16[32,96], index: 1, kind: input, shape index: {}]   ;;  %s2702_s2 = inlined_call_operand.vmem [shape: f32[32,1], index: 2, kind: input, shape index: {}]   ;;  %s2703_s3 = inlined_call_operand.vmem [shape: bf16[32,96], index: 3, kind: input, shape index: {}]   ;;  %s2704_s4 = inlined_call_operand.vmem [shape: f32[32,1], index: 4, kind: input, shape index: {}]   ;;  %s2705_s5 = inlined_call_operand.hbm [shape: f32[2,32,384], index: 5, kind: output, shape index: {}]  }
   0x1   :  { %2734 = sst [smem:[#allocation27_spill]] %s2701_s1 }
   0x2   :  { %2735 = sst [smem:[#allocation28_spill]] %s2702_s2 }
   0x3   :  { %2736 = sst [smem:[#allocation29_spill]] %s2703_s3 }
   0x4   :  { %2737 = sst [smem:[#allocation30_spill]] %s2704_s4 }
   0x5   :  { %2738 = sst [smem:[#allocation31_spill]] %s2705_s5 }
   0x6   :  { %10 = vsyncpa [#allocation5], 0 }
   0x7   :  { %12 = vsyncpa [#allocation5 + $0x1], 0  ;;  %s1781_s18 = smov 0   ;;  %s1783_s19 = smov 0  }
   0x8   :  { %s1785_s20 = smov 0   ;;  %s1787_s21 = smov 0  }
   0x9   :  { %s1789_s22 = smov 0   ;;  %s1791_s23 = smov 0  }
   0xa   :  { %s1793_s24 = smov 0   ;;  %s1795_s25 = smov 0  }
   0xb LB: > { %2739 = sst [smem:[#allocation16_spill]] %s1711_s18  ;;  %s1119_s26 = sadd.s32 4294967295, %s1739_s25   ;;  %s1739_s25 = sphi %s1795_s25, %s18_s25   ;;  %s1735_s24 = sphi %s1793_s24, %s2800_s24   ;;  %s1731_s23 = sphi %s1791_s23, %s2799_s23   ;;  %s1727_s22 = sphi %s1789_s22, %s2798_s22   ;;  %s1723_s21 = sphi %s1787_s21, %s2797_s21   ;;  %s1719_s20 = sphi %s1785_s20, %s2796_s20   ;;  %s1715_s19 = sphi %s1783_s19, %s2795_s19   ;;  %s1711_s18 = sphi %s1781_s18, %s2794_s18  }
   0xc   : > { %2740 = sst [smem:[#allocation17_spill]] %s1715_s19  ;;  %s1120_s27 = sadd.s32 4294967294, %s1739_s25  }
   0xd   : > { %2741 = sst [smem:[#allocation18_spill]] %s1719_s20  ;;  %s27_s28 = sadd.s32 1, %s1731_s23 }
   0xe   : > { %2742 = sst [smem:[#allocation19_spill]] %s1731_s23  ;;  %p28_p0 = scmp.ge.s32.totalorder %s27_s28, 3 }
   0xf   : > { %2743 = sst [smem:[#allocation20_spill]] %s1735_s24  ;;  %s30_s29 = sadd.s32 1, %s1735_s24 }
  0x10   : > { %2744 = sst [smem:[#allocation21_spill]] %s1739_s25  ;;  %p133_p1 = scmp.ne.s32.totalorder %s1719_s20, %s1715_s19 }
  0x11   : > { %p134_p2 = scmp.eq.s32.totalorder %s1119_s26, 5  ;;  %s2802_s28 = smov (%p28_p0, %s27_s28), 0 }
  0x12   : > { %2745 = sst [smem:[#allocation22_spill]] %s2802_s28  ;;  %s2804_s29 = smov (!%p28_p0, %s30_s29), %s1735_s24 }
  0x13   : > { %s119_s30 = ssub.s32 %s1731_s23, %s2802_s28  ;;  %p1832_p3 = por %p134_p2, %p133_p1 }
  0x14   : > { %p32_p4 = scmp.ge.s32.totalorder %s2804_s29, 2  ;;  %p139_p5 = scmp.ne.s32.totalorder %s1715_s19, %s1711_s18 }
  0x15   : > { %s2746_s6 = scalar_select %p1832_p3, 1, 0 }
  0x16   : > { %p140_p6 = scmp.eq.s32.totalorder %s1120_s27, 5  ;;  %p1122_p7 = scmp.ge.s32.totalorder %s1739_s25, 1 }
  0x17   : > { %2747 = sst [smem:[#allocation23_spill]] %s2746_s6  ;;  %s2806_s29 = smov (%p32_p4, %s2804_s29), 0 }
  0x18   : > { %2748 = sst [smem:[#allocation24_spill]] %s2806_s29  ;;  %p1841_p8 = por %p140_p6, %p139_p5 }
  0x19   : > { %p170_p9 = scmp.lt.s32.totalorder %s1739_s25, 7  ;;  %s118_s8 = ssub.s32 %s1735_s24, %s2806_s29 }
  0x1a   : > { %s2749_s7 = scalar_select %p1841_p8, 1, 0 }
  0x1b   : > { %s123_s9 = sadd.s32 1, %s1719_s20  ;;  %s120_s10 = sor.u32 %s119_s30, %s118_s8 }
  0x1c   : > { %2750 = sst [smem:[#allocation25_spill]] %s2749_s7  ;;  %p171_p10 = pnand %p1122_p7, %p170_p9 }
  0x1d   : > { %p121_p11 = scmp.eq.s32.totalorder %s120_s10, 0  ;;  %s2706_s12 = sand.u32 (!%p171_p10), 1, %s1715_s19  }
  0x1e   : > { %174 = sbr.rel (%p171_p10) target bundleno = 1013 (0x3f5), region = 36  ;;  %p192_p12 = scmp.lt.s32.totalorder (!%p171_p10), %s1723_s21, 0 }
  0x1f   : > { %s1850_s11 = scalar_select %p121_p11, %s1719_s20, %s123_s9  }
  0x20   : > { %s1856_s13 = sshll.u32 (!%p171_p10), %s2706_s12, 5  ;;  %s193_s14 = ssub.s32 (!%p171_p10), 0, %s1723_s21 }
  0x21   : > { %2751 = sst [smem:[#allocation26_spill]] %s1850_s11  ;;  %s1124_s15 = smin.u32 (!%p171_p10), %s1723_s21, %s193_s14 }
  0x22   : > { %s195_s16 = sand.u32 (!%p171_p10), 1, %s1124_s15   ;;  %p2713_p13 = scmp.eq.s32.totalorder (!%p171_p10), %s1723_s21, 0 }
  0x23   : > { %s196_s17 = ssub.s32 (!%p171_p10), 0, %s195_s16  ;;  %p2712_p0 = scmp.ge.s32.totalorder (!%p171_p10), %s1723_s21, 1 }
  0x24   : > { %s1863_s27 = sshll.u32 (!%p171_p10), %s1723_s21, 7  ;;  %s1866_s30 = smul.u32 (!%p171_p10), 12, %s1727_s22 }
  0x25   : > { %s2808_s17 = smov (!%p192_p12, %s196_s17), %s195_s16  ;;  %s2710_s8 = sadd.s32 4294967168, %s1863_s27 }
  0x26   : > { %p1126_p1 = scmp.lt.s32.totalorder %s2808_s17, 0  ;;  %s202_s26 = sadd.s32 2, %s2808_s17 }
  0x27   : > { %p1875_p2 = pnand %p2712_p0, %p2713_p13  ;;  %s214_s10 = sshra.s32 %s2710_s8, 7 }
  0x28   : > { %s2810_s26 = smov (!%p1126_p1, %s202_s26), %s2808_s17  ;;  %s217_s15 = sadd.s32 %s1866_s30, %s214_s10 }
  0x29   : > { %s1186_s14 = smul.u32 96, %s2810_s26  ;;  %s1130_s16 = sshll.u32 %s217_s15, 7 }
  0x2a   : > { %s223_s22 = smul.u32 3, %s2810_s26  ;;  %s1887_s29 = scalar_lea.hbm %s2700_s0, %s1130_s16 }
  0x2b   : > { %s1889_s28 = scalar_lea.vmem [#allocation2], %s1186_s14  ;;  %s1459_s15 = scalar_lea.hbm %s1887_s29, 512 }
  0x2c   : > { %s226_s24 = sshll.u32 %s1889_s28, 4  ;;  %s1894_s8 = scalar_lea.sflag [#allocation3], %s223_s22  ;;  %s1892_s24 = int_to_ptr.vmem [resolvable:$true] %s226_s24 }
  0x2d   : > { %s1897_s10 = scalar_lea.sflag %s1894_s8, 1 [#allocation3]  ;;  %p1460_p4 = scmp.ne.s32.totalorder %s1887_s29, %s1459_s15 }
  0x2e   : > { %p1461_p5 = pneg %p1875_p2  ;;  %s1909_s16 = scalar_lea.hbm %s2700_s0, 3072 }
  0x2f   : > { %p1465_p9 = scmp.lt.u32.totalorder %s1887_s29, %s2700_s0  ;;  %p1466_p10 = scmp.lt.u32.totalorder %s1909_s16, %s1459_s15 }
  0x30   : > { %p1462_p6 = pnand %p1461_p5, %p1460_p4  ;;  %p1468_p12 = scmp.lt.u32.totalorder %s1459_s15, %s1887_s29 }
  0x31   : > { %p1467_p11 = por %p1466_p10, %p1465_p9 }
  0x32   : > { %p1463_p7 = pneg %p1462_p6 }
  0x33   : > { %p1469_p1 = por %p1468_p12, %p1467_p11 }
  0x35   : > { %p1470_p0 = pnand %p1469_p1, %p1463_p7 }
  0x37   : > { %1473 = shalt.err (!%p1470_p0)  }
  0x38   : > { %s1474_s22 = scalar_lea.vmem %s1892_s24, 512  ;;  %s1741_s12 = smov [#allocation2]  }
  0x39   : > { %p1475_p4 = scmp.ne.s32.totalorder %s1892_s24, %s1474_s22  ;;  %s1479_s23 = sshll.u32 %s1741_s12, 4  ;;  %s1922_s23 = int_to_ptr.vmem [resolvable:$false] %s1479_s23 }
  0x3a   : > { %s1925_s15 = scalar_lea.vmem %s1922_s23, 3072  ;;  %p1482_p0 = scmp.lt.s32.totalorder %s1892_s24, %s1922_s23 }
  0x3b   : > { %p1477_p6 = pnand %p1475_p4, %p1461_p5  ;;  %p1483_p7 = scmp.lt.s32.totalorder %s1925_s15, %s1474_s22 }
  0x3d   : > { %p1478_p13 = pneg %p1477_p6  ;;  %p1484_p9 = por %p1483_p7, %p1482_p0 }
  0x3f   : > { %p1485_p10 = pnand %p1484_p9, %p1478_p13 }
  0x41   : > { %1488 = shalt.err (!%p1485_p10)  }
  0x42   : > { %s1742_s14 = smov 384   ;;  %s1743_s17 = smov 8  }
  0x43   : > { %1235 = dma.hbm_to_vmem [thread:$0]  (!%p1875_p2), %s1887_s29, 512, %s1892_s24, %s1894_s8, %s1742_s14, %s1742_s14, %s1743_s17 }
  0x44   : > { %s1939_s22 = sadd.s32 128, %s1863_s27  ;;  %s1942_s12 = scalar_lea.sflag %s1894_s8, 2 [#allocation3] }
  0x45   : > { %s231_s11 = sshra.s32 %s1863_s27, 7  ;;  %s1028_s20 = scalar_lea.vmem %s1889_s28, 8 [#allocation2] }
  0x46   : > { %s234_s7 = sadd.s32 %s231_s11, %s1866_s30  ;;  %s245_s18 = sshll.u32 %s1028_s20, 4  ;;  %s246_s18 = int_to_ptr.vmem [resolvable:$true] %s245_s18 }
  0x47   : > { %s1133_s25 = sshll.u32 %s234_s7, 7  ;;  %p2753_p5 = scmp.eq.s32.totalorder %s1723_s21, 0 }
  0x48   : > { %s236_s19 = scalar_lea.hbm %s2700_s0, %s1133_s25 }
  0x49   : > { %s1489_s9 = scalar_lea.hbm %s236_s19, 512  ;;  %p1494_p2 = scmp.lt.u32.totalorder %s236_s19, %s2700_s0 }
  0x4a   : > { %p1490_p13 = scmp.ne.s32.totalorder %s236_s19, %s1489_s9  ;;  %p1495_p1 = scmp.lt.u32.totalorder %s1909_s16, %s1489_s9 }
  0x4b   : > { %p1497_p6 = scmp.lt.u32.totalorder %s1489_s9, %s236_s19 }
  0x4c   : > { %p1491_p11 = pnand %p1490_p13, %p2753_p5  ;;  %p1496_p4 = por %p1495_p1, %p1494_p2 }
  0x4e   : > { %p1492_p12 = pneg %p1491_p11  ;;  %p1498_p0 = por %p1497_p6, %p1496_p4 }
  0x50   : > { %p1499_p7 = pnand %p1498_p0, %p1492_p12 }
  0x52   : > { %1502 = shalt.err (!%p1499_p7)  }
  0x53   : > { %s1503_s20 = scalar_lea.vmem %s246_s18, 512  ;;  %p2754_p10 = pmov %p2753_p5 }
  0x54   : > { %p1504_p9 = scmp.ne.s32.totalorder %s246_s18, %s1503_s20  ;;  %p1510_p13 = scmp.lt.s32.totalorder %s246_s18, %s1922_s23 }
  0x55   : > { %p1511_p5 = scmp.lt.s32.totalorder %s1925_s15, %s1503_s20 }
  0x56   : > { %p1505_p8 = pnand %p1504_p9, %p2754_p10 }
  0x57   : > { %p1512_p11 = por %p1511_p5, %p1510_p13 }
  0x58   : > { %p1506_p3 = pneg %p1505_p8 }
  0x5a   : > { %p1513_p1 = pnand %p1512_p11, %p1506_p3 }
  0x5c   : > { %1516 = shalt.err (!%p1513_p1)  }
  0x5d   : > { %p2755_p2 = pmov %p2754_p10  ;;  %p2724_p8 = scmp.lt.s32.totalorder %s1723_s21, 2 }
  0x5e   : > { %s254_s5 = sshra.s32 %s1939_s22, 7  ;;  %s1039_s6 = scalar_lea.vmem %s1889_s28, 16 [#allocation2] }
  0x5f   : > { %1236 = dma.hbm_to_vmem [thread:$0]  (%p2755_p2), %s236_s19, 512, %s246_s18, %s1897_s10, %s1742_s14, %s1742_s14, %s1743_s17 }
  0x60   : > { %s256_s25 = sadd.s32 %s254_s5, %s1866_s30  ;;  %s265_s11 = sshll.u32 %s1039_s6, 4  ;;  %s1975_s11 = int_to_ptr.vmem [resolvable:$true] %s265_s11 }
  0x61   : > { %s1136_s7 = sshll.u32 %s256_s25, 7  ;;  %p2756_p3 = pmov %p2755_p2 }
  0x62   : > { %s1973_s29 = scalar_lea.hbm %s2700_s0, %s1136_s7  ;;  %s1986_s19 = sadd.s32 1, %s1723_s21 }
  0x63   : > { %p1981_p12 = pnand %p2724_p8, %p2756_p3  ;;  %p2730_p4 = scmp.lt.s32.totalorder %s1986_s19, 3 }
  0x64   : > { %s274_s20 = ssub.s32 1, %s2810_s26  ;;  %s1991_s5 = scalar_lea.hbm %s1973_s29, 512 }
  0x65   : > { %p2725_p6 = scmp.ne.s32.totalorder %s1973_s29, %s1991_s5  ;;  %p1519_p0 = pneg %p1981_p12 }
  0x66   : > { %p1523_p10 = scmp.lt.u32.totalorder %s1973_s29, %s2700_s0  ;;  %p1524_p13 = scmp.lt.u32.totalorder %s1909_s16, %s1991_s5 }
  0x67   : > { %p1520_p7 = pnand %p1519_p0, %p2725_p6  ;;  %p1526_p11 = scmp.lt.u32.totalorder %s1991_s5, %s1973_s29 }
  0x68   : > { %p1525_p5 = por %p1524_p13, %p1523_p10 }
  0x69   : > { %p1521_p9 = pneg %p1520_p7 }
  0x6a   : > { %p2008_p1 = por %p1526_p11, %p1525_p5 }
  0x6c   : > { %s2758_s26 = scalar_select %p2008_p1, 1, 0 }
  0x6d   : > { %p1528_p2 = pnand %p2008_p1, %p1521_p9 }
  0x6f   : > { %1531 = shalt.err (!%p1528_p2)  }
  0x70   : > { %s1532_s7 = scalar_lea.vmem %s1975_s11, 512  ;;  %p1540_p6 = scmp.lt.s32.totalorder %s1975_s11, %s1922_s23 }
  0x71   : > { %p1533_p3 = scmp.ne.s32.totalorder %s1975_s11, %s1532_s7  ;;  %p1541_p10 = scmp.lt.s32.totalorder %s1925_s15, %s1532_s7 }
  0x73   : > { %p1535_p7 = pnand %p1533_p3, %p1519_p0  ;;  %p1542_p13 = por %p1541_p10, %p1540_p6 }
  0x75   : > { %p1536_p8 = pneg %p1535_p7 }
  0x77   : > { %p1543_p5 = pnand %p1542_p13, %p1536_p8 }
  0x79   : > { %1546 = shalt.err (!%p1543_p5)  }
  0x7a   : > { %1239 = dma.hbm_to_vmem [thread:$0]  (!%p1981_p12), %s1973_s29, 512, %s1975_s11, %s1942_s12, %s1742_s14, %s1742_s14, %s1743_s17 }
  0x7b   : > { %p1256_p0 = scmp.ge.s32.totalorder %s1986_s19, 1  ;;  %s280_s9 = sadd.s32 4294967168, %s1939_s22 }
  0x7c   : > { %s1189_s24 = smul.u32 96, %s274_s20  ;;  %s281_s25 = sshra.s32 %s280_s9, 7 }
  0x7d   : > { %s290_s6 = smul.u32 3, %s274_s20  ;;  %s284_s7 = sadd.s32 %s281_s25, %s1866_s30 }
  0x7e   : > { %s1141_s3 = sshll.u32 %s284_s7, 7  ;;  %s2035_s2 = scalar_lea.vmem [#allocation2], %s1189_s24 }
  0x7f   : > { %s2033_s1 = scalar_lea.hbm %s2700_s0, %s1141_s3  ;;  %s293_s11 = sshll.u32 %s2035_s2, 4  ;;  %s2038_s11 = int_to_ptr.vmem [resolvable:$true] %s293_s11 }
  0x80   : > { %p2042_p8 = pnand %p1256_p0, %p2730_p4  ;;  %s1058_s4 = scalar_lea.vmem %s2035_s2, 8 [#allocation2] }
  0x81   : > { %s2047_s3 = scalar_lea.sflag [#allocation3], %s290_s6  ;;  %s1547_s25 = scalar_lea.hbm %s2033_s1, 512 }
  0x82   : > { %s2759_s20 = scalar_select %p2042_p8, 1, 0 }
  0x83   : > { %s1061_s9 = scalar_lea.sflag %s2047_s3, 1 [#allocation3]  ;;  %p1548_p12 = scmp.ne.s32.totalorder %s2033_s1, %s1547_s25 }
  0x84   : > { %p1549_p6 = pneg %p2042_p8  ;;  %p1553_p2 = scmp.lt.u32.totalorder %s2033_s1, %s2700_s0 }
  0x85   : > { %p1554_p3 = scmp.lt.u32.totalorder %s1909_s16, %s1547_s25  ;;  %p1556_p10 = scmp.lt.u32.totalorder %s1547_s25, %s2033_s1 }
  0x86   : > { %p1550_p9 = pnand %p1549_p6, %p1548_p12 }
  0x87   : > { %p1555_p7 = por %p1554_p3, %p1553_p2 }
  0x88   : > { %p1551_p11 = pneg %p1550_p9 }
  0x89   : > { %p1557_p13 = por %p1556_p10, %p1555_p7 }
  0x8b   : > { %p1558_p5 = pnand %p1557_p13, %p1551_p11 }
  0x8d   : > { %1561 = shalt.err (!%p1558_p5)  }
  0x8e   : > { %s1562_s6 = scalar_lea.vmem %s2038_s11, 512  ;;  %p1570_p9 = scmp.lt.s32.totalorder %s2038_s11, %s1922_s23 }
  0x8f   : > { %p1563_p0 = scmp.ne.s32.totalorder %s2038_s11, %s1562_s6  ;;  %p1571_p1 = scmp.lt.s32.totalorder %s1925_s15, %s1562_s6 }
  0x91   : > { %p1565_p4 = pnand %p1563_p0, %p1549_p6  ;;  %p1572_p8 = por %p1571_p1, %p1570_p9 }
  0x93   : > { %p1566_p12 = pneg %p1565_p4 }
  0x95   : > { %p1573_p2 = pnand %p1572_p8, %p1566_p12 }
  0x97   : > { %1576 = shalt.err (!%p1573_p2)  }
  0x98   : > { %p2760_p3 = scmp.ne.s32.totalorder %s2759_s20, 0  ;;  %s312_s18 = sshll.u32 %s1058_s4, 4  ;;  %s313_s18 = int_to_ptr.vmem [resolvable:$true] %s312_s18 }
  0x99   : > { %s320_s25 = sadd.s32 128, %s1939_s22  ;;  %p2761_p1 = scmp.lt.s32.totalorder %s1986_s19, 3 }
  0x9a   : > { %1243 = dma.hbm_to_vmem [thread:$0]  (!%p2760_p3), %s2033_s1, 512, %s2038_s11, %s2047_s3, %s1742_s14, %s1742_s14, %s1743_s17 }
  0x9b   : > { %p2762_p8 = scmp.ne.s32.totalorder %s1973_s29, %s1991_s5  ;;  %p2763_p7 = scmp.ne.s32.totalorder %s2758_s26, 0 }
  0x9d   : > { %p1579_p6 = pnand %p2762_p8, %p2761_p1 }
  0x9f   : > { %p1580_p11 = pneg %p1579_p6 }
  0xa1   : > { %p1587_p10 = pnand %p1580_p11, %p2763_p7 }
  0xa3   : > { %1590 = shalt.err (!%p1587_p10)  }
  0xa4   : > { %s1591_s20 = scalar_lea.vmem %s313_s18, 512  ;;  %p2764_p5 = pmov %p2761_p1 }
  0xa5   : > { %p1592_p13 = scmp.ne.s32.totalorder %s313_s18, %s1591_s20  ;;  %p1598_p9 = scmp.lt.s32.totalorder %s313_s18, %s1922_s23 }
  0xa6   : > { %p1599_p2 = scmp.lt.s32.totalorder %s1925_s15, %s1591_s20 }
  0xa7   : > { %p1593_p0 = pnand %p1592_p13, %p2764_p5 }
  0xa8   : > { %p1600_p3 = por %p1599_p2, %p1598_p9 }
  0xa9   : > { %p1594_p12 = pneg %p1593_p0 }
  0xab   : > { %p1601_p4 = pnand %p1600_p3, %p1594_p12 }
  0xad   : > { %1604 = shalt.err (!%p1601_p4)  }
  0xae   : > { %1244 = dma.hbm_to_vmem [thread:$0]  (%p2761_p1), %s1973_s29, 512, %s313_s18, %s1061_s9, %s1742_s14, %s1742_s14, %s1743_s17 }
  0xaf   : > { %s321_s1 = sshra.s32 %s320_s25, 7  ;;  %s1069_s22 = scalar_lea.vmem %s2035_s2, 16 [#allocation2] }
  0xb0   : > { %s323_s5 = sadd.s32 %s321_s1, %s1866_s30  ;;  %s332_s11 = sshll.u32 %s1069_s22, 4  ;;  %s333_s11 = int_to_ptr.vmem [resolvable:$true] %s332_s11 }
  0xb1   : > { %s1147_s26 = sshll.u32 %s323_s5, 7  ;;  %s1072_s6 = scalar_lea.sflag %s2047_s3, 2 [#allocation3] }
  0xb2   : > { %s2101_s7 = scalar_lea.hbm %s2700_s0, %s1147_s26  ;;  %p2765_p4 = pmov %p2761_p1 }
  0xb3   : > { %p2766_p8 = scmp.lt.s32.totalorder %s1986_s19, 2  ;;  %s1605_s2 = scalar_lea.hbm %s2101_s7, 512 }
  0xb4   : > { %p1606_p11 = scmp.ne.s32.totalorder %s2101_s7, %s1605_s2  ;;  %p1611_p5 = scmp.lt.u32.totalorder %s2101_s7, %s2700_s0 }
  0xb5   : > { %p2108_p6 = pnand %p2766_p8, %p2765_p4  ;;  %p1612_p0 = scmp.lt.u32.totalorder %s1909_s16, %s1605_s2 }
  0xb6   : > { %p1614_p9 = scmp.lt.u32.totalorder %s1605_s2, %s2101_s7 }
  0xb7   : > { %s2767_s29 = scalar_select %p2108_p6, 1, 0 }
  0xb8   : > { %p1607_p7 = pneg %p2108_p6  ;;  %p1613_p12 = por %p1612_p0, %p1611_p5 }
  0xba   : > { %p1608_p10 = pnand %p1607_p7, %p1606_p11  ;;  %p1615_p2 = por %p1614_p9, %p1613_p12 }
  0xbc   : > { %p1609_p13 = pneg %p1608_p10 }
  0xbe   : > { %p1616_p3 = pnand %p1615_p2, %p1609_p13 }
  0xc0   : > { %1619 = shalt.err (!%p1616_p3)  }
  0xc1   : > { %s1620_s19 = scalar_lea.vmem %s333_s11, 512  ;;  %p1628_p6 = scmp.lt.s32.totalorder %s333_s11, %s1922_s23 }
  0xc2   : > { %p1621_p1 = scmp.ne.s32.totalorder %s333_s11, %s1620_s19  ;;  %p1629_p11 = scmp.lt.s32.totalorder %s1925_s15, %s1620_s19 }
  0xc4   : > { %p1623_p4 = pnand %p1621_p1, %p1607_p7  ;;  %p1630_p10 = por %p1629_p11, %p1628_p6 }
  0xc6   : > { %p1624_p8 = pneg %p1623_p4 }
  0xc8   : > { %p1631_p0 = pnand %p1630_p10, %p1624_p8 }
  0xca   : > { %1634 = shalt.err (!%p1631_p0)  }
  0xcb   : > { %p2768_p5 = scmp.ne.s32.totalorder %s2767_s29, 0  ;;  %s2131_s16 = scalar_lea.vmem [#allocation4], %s1856_s13 }
  0xcc   : > { %p2769_p13 = scmp.ge.s32.totalorder %s1723_s21, 1 }
  0xcd   : > { %1247 = dma.hbm_to_vmem [thread:$0]  (!%p2768_p5), %s2101_s7, 512, %s333_s11, %s1072_s6, %s1742_s14, %s1742_s14, %s1743_s17 }
  0xce   : > { %1696 = dma.done.wait (%p2769_p13), %s1894_s8, 512  ;;  %p2770_p7 = pmov %p2769_p13 }
  0xd0   : > { %1698 = vsyncadd (%p2770_p7), %s1894_s8, 4294966784 }
  0xd1   : > { %1699 = dma.done.wait %s1897_s10, 512 }
  0xd2   : > { %1700 = vsyncadd %s1897_s10, 4294966784  ;;  %p2771_p6 = scmp.lt.s32.totalorder %s1723_s21, 2 }
  0xd4   : > { %1702 = dma.done.wait (%p2771_p6), %s1942_s12, 512  ;;  %p2772_p12 = pmov %p2771_p6 }
  0xd5   : > { %v365_v0 = vlaneseq  ;;  %s2773_s13 = sadd.s32 4294967168, %s1863_s27  ;;  %v392_v9 = vld [vmem:[%s1889_s28 + $0x30] sm:$0xff]  ;;  %v395_v10 = vld [vmem:[%s1889_s28 + $0x48] sm:$0xff]  ;;  %v386_v13 = vld [vmem:[%s1889_s28] sm:$0xff]  ;;  %s1744_s27 = smov 1  }
  0xd6   : > { %1704 = vsyncadd (%p2772_p12), %s1942_s12, 4294966784  ;;  %v370_v1 = vstv %s2773_s13  ;;  %v389_v14 = vld [vmem:[%s1889_s28 + $0x18] sm:$0xff]  ;;  %v388_v20 = vld [vmem:[%s1889_s28 + $0x10] sm:$0xff]  ;;  %s2780_s23 = sld [smem:[#allocation28_spill]]  ;;  %s2782_s11 = sld [smem:[#allocation27_spill]] }
  0xd7   : > { %v2149_v2 = vand.u32 127, %v365_v0  ;;  %v391_v21 = vld [vmem:[%s1889_s28 + $0x28] sm:$0xff]  ;;  %v390_v30 = vld [vmem:[%s1889_s28 + $0x20] sm:$0xff]  ;;  %v397_v38 = vld [vmem:[%s1889_s28 + $0x58] sm:$0xff]  ;;  %s1747_s7 = smov 3   ;;  %s1748_s6 = smov 125  }
  0xd8   : > { %v387_v25 = vld [vmem:[%s1889_s28 + $0x8] sm:$0xff]  ;;  %v394_v37 = vld [vmem:[%s1889_s28 + $0x40] sm:$0xff]  ;;  %v393_v39 = vld [vmem:[%s1889_s28 + $0x38] sm:$0xff]  ;;  %s2783_s9 = sld [smem:[#allocation30_spill]]  ;;  %s2784_s12 = sld [smem:[#allocation29_spill]] }
  0xd9   : > { %v371_v3 = vadd.s32 %v370_v1, %v2149_v2  ;;  %v368_v4 = vadd.s32 256, %v2149_v2  ;;  %v367_v5 = vadd.s32 128, %v2149_v2  ;;  %v396_v46 = vld [vmem:[%s1889_s28 + $0x50] sm:$0xff]  ;;  %s1745_s28 = smov 127   ;;  %s942_s20 = sadd.s32 %s1723_s21, %s1866_s30 }
  0xda   : > { %s2785_s1 = sld [smem:[#allocation17_spill]]  ;;  %s2786_s22 = sld [smem:[#allocation23_spill]] }
  0xdb   : > { %vm374_vm0 = vcmp.ge.s32.totalorder %v371_v3, 0  ;;  %vm377_vm1 = vcmp.lt.s32.totalorder %v371_v3, 384  ;;  %v373_v6 = vadd.s32 %v370_v1, %v368_v4  ;;  %v372_v7 = vadd.s32 %v370_v1, %v367_v5  ;;  %s1177_s5 = sshll.u32 %s942_s20, 7  ;;  %s945_s26 = sshll.u32 %s2131_s16, 4  ;;  %s2641_s26 = int_to_ptr.vmem [resolvable:$true] %s945_s26 }
  0xdc   : > { %vm2154_vm2 = vmand %vm374_vm0, %vm377_vm1  ;;  %s2781_s15 = smov %s2780_s23  ;;  %s1635_s29 = scalar_lea.vmem %s2641_s26, 512 }
  0xdd   : > { %v2162_v11 = vsel %vm2154_vm2, %v392_v9, 0.0  ;;  %v2166_v12 = vsel %vm2154_vm2, %v395_v10, 0.0  ;;  %vm376_vm3 = vcmp.ge.s32.totalorder %v373_v6, 0  ;;  %vm379_vm4 = vcmp.lt.s32.totalorder %v373_v6, 384  ;;  %v548_v10 = vld [vmem:[%s2780_s23] sm:$0xff]  ;;  %p1636_p9 = scmp.ne.s32.totalorder %s2641_s26, %s1635_s29  ;;  %s1749_s2 = smov [#allocation4]  }
  0xde   : > { %vm422_vm5 = vcmp.ge.f32.partialorder %v2162_v11, 0.0  ;;  %vm425_vm6 = vcmp.ge.f32.partialorder %v2166_v12, 0.0  ;;  %v434_v15 = vmul.f32 0.1, %v2162_v11  ;;  %v437_v16 = vmul.f32 0.1, %v2166_v12  ;;  %vm2174_vm7 = vmand %vm376_vm3, %vm379_vm4 }
  0xdf   : > { %v2180_v18 = vsel %vm2154_vm2, %v386_v13, 0.0  ;;  %v2184_v19 = vsel %vm2154_vm2, %v389_v14, 0.0  ;;  %vm375_vm8 = vcmp.ge.s32.totalorder %v372_v7, 0  ;;  %vm378_vm9 = vcmp.lt.s32.totalorder %v372_v7, 384  ;;  %v549_v13 = vld [vmem:[%s2781_s15 + $0x8] sm:$0xff]  ;;  %v550_v14 = vld [vmem:[%s2781_s15 + $0x10] sm:$0xff] }
  0xe0   : > { %v2189_v22 = vsel %vm422_vm5, %v2162_v11, %v434_v15  ;;  %v2192_v23 = vsel %vm425_vm6, %v2166_v12, %v437_v16  ;;  %vm416_vm10 = vcmp.ge.f32.partialorder %v2180_v18, 0.0  ;;  %vm419_vm11 = vcmp.ge.f32.partialorder %v2184_v19, 0.0  ;;  %vm2196_vm12 = vmand %vm375_vm8, %vm378_vm9  ;;  %v551_v15 = vld [vmem:[%s2781_s15 + $0x18] sm:$0xff]  ;;  %v834_v17 = vld [vmem:[%s2783_s9 + $0x8] sm:$0xff]  ;;  %s2788_s30 = sand.u32 1, %s2785_s1   ;;  %p2789_p2 = scmp.ne.s32.totalorder %s2786_s22, 0 }
  0xe1   : > { %v1338_v26 = vpack.i.bf16 %v2192_v23, %v2189_v22  ;;  %v428_v27 = vmul.f32 0.1, %v2180_v18  ;;  %v431_v28 = vmul.f32 0.1, %v2184_v19  ;;  %v2207_v29 = vsel %vm2174_vm7, %v388_v20, 0.0  ;;  %s1639_s18 = sshll.u32 %s1749_s2, 4  ;;  %s1640_s18 = int_to_ptr.vmem [resolvable:$false] %s1639_s18 }
  0xe2   : > { %v2212_v31 = vsel %vm2174_vm7, %v391_v21, 0.0  ;;  %vm418_vm13 = vcmp.ge.f32.partialorder %v2207_v29, 0.0  ;;  %v430_v32 = vmul.f32 0.1, %v2207_v29  ;;  %v2218_v33 = vsel %vm2196_vm12, %v387_v25, 0.0  ;;  %p1637_p3 = pnand %p1636_p9, %p2789_p2  ;;  %s1641_s19 = scalar_lea.vmem %s1640_s18, 1024 }
  0xe3   : > { %1339 = vrot.lane.b32.xlu1 %v1338_v26, %s1744_s27  ;;  %v2222_v34 = vsel %vm416_vm10, %v2180_v18, %v428_v27  ;;  %v2225_v35 = vsel %vm419_vm11, %v2184_v19, %v431_v28  ;;  %vm421_vm14 = vcmp.ge.f32.partialorder %v2212_v31, 0.0  ;;  %v433_v36 = vmul.f32 0.1, %v2212_v31  ;;  %p1642_p4 = scmp.lt.s32.totalorder %s2641_s26, %s1640_s18  ;;  %p1643_p8 = scmp.lt.s32.totalorder %s1641_s19, %s1635_s29 }
  0xe4   : > { %v1333_v40 = vpack.i.bf16 %v2225_v35, %v2222_v34  ;;  %v442_v41 = vsel %vm418_vm13, %v2207_v29, %v430_v32  ;;  %v2237_v42 = vsel %vm2196_vm12, %v390_v30, 0.0  ;;  %vm417_vm15 = vcmp.ge.f32.partialorder %v2218_v33, 0.0  ;;  %p1638_p1 = pneg %p1637_p3 }
  0xe5   : > { %v445_v43 = vsel %vm421_vm14, %v2212_v31, %v433_v36  ;;  %vm420_vm0 = vcmp.ge.f32.partialorder %v2237_v42, 0.0  ;;  %v429_v44 = vmul.f32 0.1, %v2218_v33  ;;  %v432_v45 = vmul.f32 0.1, %v2237_v42  ;;  %p1644_p11 = por %p1643_p8, %p1642_p4 }
  0xe6   : > { %1334 = vrot.lane.b32.xlu0 %v1333_v40, %s1744_s27  ;;  %v1348_v47 = vpack.i.bf16 %v445_v43, %v442_v41  ;;  %v2248_v48 = vsel %vm2174_vm7, %v394_v37, 0.0  ;;  %v2252_v49 = vsel %vm2174_vm7, %v397_v38, 0.0  ;;  %v2256_v50 = vsel %vm2196_vm12, %v393_v39, 0.0 }
  0xe7   : > { %v2259_v51 = vsel %vm417_vm15, %v2218_v33, %v429_v44  ;;  %v2262_v52 = vsel %vm420_vm0, %v2237_v42, %v432_v45  ;;  %vm424_vm1 = vcmp.ge.f32.partialorder %v2248_v48, 0.0  ;;  %vm427_vm3 = vcmp.ge.f32.partialorder %v2252_v49, 0.0  ;;  %p1645_p10 = pnand %p1644_p11, %p1638_p1 }
  0xe8   : > { %1349 = vrot.lane.b32.xlu1 %v1348_v47, %s1744_s27  ;;  %v1343_v53 = vpack.i.bf16 %v2262_v52, %v2259_v51  ;;  %v436_v54 = vmul.f32 0.1, %v2248_v48  ;;  %v439_v55 = vmul.f32 0.1, %v2252_v49  ;;  %v2273_v56 = vsel %vm2196_vm12, %v396_v46, 0.0 }
  0xe9   : > { %vm423_vm4 = vcmp.ge.f32.partialorder %v2256_v50, 0.0  ;;  %vm426_vm5 = vcmp.ge.f32.partialorder %v2273_v56, 0.0  ;;  %v435_v57 = vmul.f32 0.1, %v2256_v50  ;;  %v438_v58 = vmul.f32 0.1, %v2273_v56 }
  0xea   : > { %1344 = vrot.lane.b32.xlu0 %v1343_v53, %s1744_s27  ;;  %v448_v59 = vsel %vm424_vm1, %v2248_v48, %v436_v54  ;;  %v451_v60 = vsel %vm427_vm3, %v2252_v49, %v439_v55  ;;  %v533_v1 = vpack.c.bf16 %v2262_v52, %v2259_v51  ;;  %v532_v3 = vpack.c.bf16 %v2225_v35, %v2222_v34 }
  0xeb   : > { %v1358_v61 = vpack.i.bf16 %v451_v60, %v448_v59  ;;  %v2283_v62 = vsel %vm423_vm4, %v2256_v50, %v435_v57  ;;  %v2286_v63 = vsel %vm426_vm5, %v2273_v56, %v438_v58  ;;  %v535_v5 = vpack.c.bf16 %v2192_v23, %v2189_v22 }
  0xec   : > { %v1353_v0 = vpack.i.bf16 %v2286_v63, %v2283_v62  ;;  %v536_v4 = vpack.c.bf16 %v2286_v63, %v2283_v62  ;;  %v1746_v6 = vmov 0   ;;  %v2304_v7 = vpack.c.bf16 %v445_v43, %v442_v41 }
  0xed   : > { %1359 = vrot.lane.b32.xlu1 %v1358_v61, %s1744_s27  ;;  %621 = vmatprep.mubr.bf16.mxu1 %v1746_v6  ;;  %v2306_v9 = vpack.c.bf16 %v451_v60, %v448_v59  ;;  %vm476_vm6 = vcmp.lt.s32.totalorder %v2149_v2, 1  ;;  %vm513_vm8 = vcmp.lt.s32.totalorder %v2149_v2, 127  ;;  %vm582_vm9 = vcmask 785408  }
  0xee   : > { %1354 = vrot.lane.b32.xlu0 %v1353_v0, %s1744_s27  ;;  %1394 = vset.pattern.permute.xlu1 %v1746_v6 }
  0xef   : > { %1393 = vset.pattern.permute.xlu0 %v1746_v6  ;;  %905 = vmatprep.mubr.bf16.mxu0 %v1746_v6 }
  0xf1   : > { %1374 = vrot.lane.b32.xlu1 %v1348_v47, %s1745_s28 }
  0xf2   : > { %1364 = vrot.lane.b32.xlu0 %v1343_v53, %s1745_s28 }
  0xf5   : > { %1379 = vrot.lane.b32.xlu1 %v1353_v0, %s1745_s28 }
  0xf6   : > { %1369 = vrot.lane.b32.xlu0 %v1333_v40, %s1745_s28 }
  0xf9   : > { %1389 = vrot.lane.b32.xlu1 %v1338_v26, %s1745_s28 }
  0xfa   : > { %1384 = vrot.lane.b32.xlu0 %v1358_v61, %s1745_s28 }
  0xfd   : > { %559 = vperm.xlu1 %1394, %v549_v13  }
  0xfe   : > { %554 = vperm.xlu0 %1393, %v548_v10  }
 0x101   : > { %564 = vperm.xlu1 %1394, %v550_v14  }
 0x102   : > { %569 = vperm.xlu0 %1393, %v551_v15  }
 0x155   : > { %v1340_v16 = vpop.permute.xlu1 %1339 }
 0x156   : > { %v1342_v39 = vunpack.i.h.bf16 %v1340_v16  ;;  %v1341_v45 = vunpack.i.l.bf16 %v1340_v16 }
 0x158   : > { %v1335_v20 = vpop.permute.xlu0 %1334 }
 0x159   : > { %v1337_v25 = vunpack.i.h.bf16 %v1335_v20  ;;  %v1336_v26 = vunpack.i.l.bf16 %v1335_v20 }
 0x15a   : > { %v2320_v21 = vpop.permute.xlu1 %1349 }
 0x15b   : > { %v1352_v27 = vunpack.i.h.bf16 %v2320_v21  ;;  %v1351_v28 = vunpack.i.l.bf16 %v2320_v21 }
 0x15c   : > { %v2325_v30 = vpop.permute.xlu0 %1344 }
 0x15d   : > { %v1347_v32 = vunpack.i.h.bf16 %v2325_v30  ;;  %v1346_v36 = vunpack.i.l.bf16 %v2325_v30  ;;  %v485_v37 = vsel %vm476_vm6, %v1351_v28, %v1336_v26  ;;  %v486_v38 = vsel %vm476_vm6, %v1352_v27, %v1337_v25 }
 0x15e   : > { %v526_v44 = vpack.c.bf16 %v486_v38, %v485_v37 }
 0x15f   : > { %v2337_v40 = vpop.permute.xlu1 %1359  ;;  %v481_v41 = vsel %vm476_vm6, %v1336_v26, %v1346_v36  ;;  %v482_v43 = vsel %vm476_vm6, %v1337_v25, %v1347_v32  ;;  %v477_v22 = vsel %vm476_vm6, %v1346_v36, %v1351_v28  ;;  %v478_v23 = vsel %vm476_vm6, %v1347_v32, %v1352_v27  ;;  %v1456_v27 = vld [vmem:[%s2782_s11 + $0x8] sm:$0xff]  }
 0x160   : > { %v1362_v46 = vunpack.i.h.bf16 %v2337_v40  ;;  %v1361_v47 = vunpack.i.l.bf16 %v2337_v40  ;;  %v1355_v53 = vpop.permute.xlu0 %1354  ;;  %v527_v54 = vpack.c.bf16 %v482_v43, %v481_v41 }
 0x161   : > { %v1357_v55 = vunpack.i.h.bf16 %v1355_v53  ;;  %v1356_v57 = vunpack.i.l.bf16 %v1355_v53 }
 0x162   : > { %589 = vmatprep.subr.bf16.mxu1 %v527_v54  ;;  %v487_v58 = vsel %vm476_vm6, %v1361_v47, %v1341_v45  ;;  %v488_v59 = vsel %vm476_vm6, %v1362_v46, %v1342_v39 }
 0x163   : > { %590 = vmatpush1.bf16.msra.mxu1 %v526_v44  ;;  %v2351_v60 = vpop.permute.xlu1 %1374  ;;  %v483_v61 = vsel %vm476_vm6, %v1341_v45, %v1356_v57  ;;  %v484_v0 = vsel %vm476_vm6, %v1342_v39, %v1357_v55  ;;  %v529_v10 = vpack.c.bf16 %v488_v59, %v487_v58  ;;  %v480_v21 = vsel %vm476_vm6, %v1357_v55, %v1362_v46 }
 0x164   : > { %v1365_v13 = vpop.permute.xlu0 %1364  ;;  %v530_v14 = vpack.c.bf16 %v484_v0, %v483_v61  ;;  %v1377_v20 = vunpack.i.h.bf16 %v2351_v60  ;;  %v1376_v25 = vunpack.i.l.bf16 %v2351_v60  ;;  %v528_v61 = vpack.c.bf16 %v478_v23, %v477_v22  ;;  %v1455_v0 = vld [vmem:[%s2782_s11] sm:$0xff]  }
 0x165   : > { %v1367_v15 = vunpack.i.h.bf16 %v1365_v13  ;;  %v1366_v16 = vunpack.i.l.bf16 %v1365_v13 }
 0x166   : > { %591 = vmatprep.subr.bf16.mxu1 %v530_v14 }
 0x167   : > { %592 = vmatpush1.bf16.msra.mxu1 %v529_v10  ;;  %v1380_v26 = vpop.permute.xlu1 %1379  ;;  %v514_v40 = vsel %vm513_vm8, %v1366_v16, %v1376_v25  ;;  %v515_v41 = vsel %vm513_vm8, %v1367_v15, %v1377_v20  ;;  %v479_v10 = vsel %vm476_vm6, %v1356_v57, %v1361_v47 }
 0x168   : > { %v1370_v37 = vpop.permute.xlu0 %1369  ;;  %593 = vmatprep.subr.bf16.mxu1 %v533_v1  ;;  %v1382_v43 = vunpack.i.h.bf16 %v1380_v26  ;;  %v1381_v44 = vunpack.i.l.bf16 %v1380_v26  ;;  %v539_v1 = vpack.c.bf16 %v515_v41, %v514_v40  ;;  %v531_v28 = vpack.c.bf16 %v480_v21, %v479_v10 }
 0x169   : > { %v1372_v38 = vunpack.i.h.bf16 %v1370_v37  ;;  %v1371_v39 = vunpack.i.l.bf16 %v1370_v37 }
 0x16b   : > { %594 = vmatpush1.bf16.msra.mxu1 %v532_v3  ;;  %v1390_v45 = vpop.permute.xlu1 %1389  ;;  %v518_v59 = vsel %vm513_vm8, %v1371_v39, %v1366_v16  ;;  %v519_v60 = vsel %vm513_vm8, %v1372_v38, %v1367_v15  ;;  %v522_v30 = vsel %vm513_vm8, %v1376_v25, %v1371_v39  ;;  %v523_v32 = vsel %vm513_vm8, %v1377_v20, %v1372_v38 }
 0x16c   : > { %v1385_v53 = vpop.permute.xlu0 %1384  ;;  %595 = vmatprep.subr.bf16.mxu1 %v536_v4  ;;  %v1392_v54 = vunpack.i.h.bf16 %v1390_v45  ;;  %v1391_v58 = vunpack.i.l.bf16 %v1390_v45  ;;  %v538_v63 = vpack.c.bf16 %v519_v60, %v518_v59  ;;  %v540_v36 = vpack.c.bf16 %v523_v32, %v522_v30 }
 0x16d   : > { %v1387_v51 = vunpack.i.h.bf16 %v1385_v53  ;;  %v1386_v52 = vunpack.i.l.bf16 %v1385_v53 }
 0x16e   : > { %v520_v3 = vsel %vm513_vm8, %v1391_v58, %v1381_v44  ;;  %v521_v4 = vsel %vm513_vm8, %v1392_v54, %v1382_v43 }
 0x16f   : > { %596 = vmatpush1.bf16.msra.mxu1 %v535_v5  ;;  %v516_v34 = vsel %vm513_vm8, %v1381_v44, %v1386_v52  ;;  %v517_v35 = vsel %vm513_vm8, %v1382_v43, %v1387_v51  ;;  %v541_v5 = vpack.c.bf16 %v521_v4, %v520_v3  ;;  %v524_v46 = vsel %vm513_vm8, %v1386_v52, %v1391_v58 }
 0x170   : > { %597 = vmatprep.subr.bf16.mxu1 %v539_v1  ;;  %v542_v62 = vpack.c.bf16 %v517_v35, %v516_v34  ;;  %v525_v47 = vsel %vm513_vm8, %v1387_v51, %v1392_v54 }
 0x173   : > { %598 = vmatpush1.bf16.msra.mxu1 %v538_v63 }
 0x174   : > { %599 = vmatprep.subr.bf16.mxu1 %v542_v62 }
 0x177   : > { %600 = vmatpush1.bf16.msra.mxu1 %v541_v5 }
 0x178   : > { %1201 = vmatprep.subr.bf16.mxu1 %v528_v61 }
 0x17a   : > { %1156 = vmatmul.mubr.msk.bf16.vlgmr.msra.gmra.mrb[0].mxu1 %vm582_vm9, %v1455_v0 }
 0x17b   : > { %1202 = vmatpush3.bf16.msra.mxu1 %v528_v61  ;;  %631 = vmatprep.mubr.bf16.mxu1 %v1746_v6 }
 0x17c   : > { %1203 = vmatprep.subr.bf16.mxu1 %v531_v28  ;;  %v2427_v13 = vpop.permute.xlu1 %559 }
 0x17d   : > { %v2425_v55 = vpop.permute.xlu0 %554 }
 0x17f   : > { %1204 = vmatpush3.bf16.msra.mxu1 %v531_v28 }
 0x180   : > { %1205 = vmatprep.subr.bf16.mxu1 %v2304_v7  ;;  %v565_v43 = vpop.permute.xlu1 %564 }
 0x181   : > { %v570_v53 = vpop.permute.xlu0 %569 }
 0x182   : > { %1157 = vmatmul.mubr.msk.bf16.gmra.mrb[4].mxu1 %vm582_vm9, %v1456_v27 }
 0x183   : > { %1206 = vmatpush3.bf16.msra.mxu1 %v2304_v7  ;;  %1213 = vmatprep.mubr.msk.bf16.mxu1 %vm582_vm9, %v1455_v0  ;;  %v543_v7 = vpack.c.bf16 %v525_v47, %v524_v46 }
 0x184   : > { %1207 = vmatprep.subr.bf16.mxu1 %v2306_v9 }
 0x187   : > { %1208 = vmatpush3.bf16.msra.mxu1 %v2306_v9 }
 0x188   : > { %1209 = vmatprep.subr.bf16.mxu1 %v540_v36 }
 0x18b   : > { %1210 = vmatpush3.bf16.msra.mxu1 %v540_v36 }
 0x18c   : > { %1211 = vmatprep.subr.bf16.mxu1 %v543_v7 }
 0x18f   : > { %1212 = vmatpush3.bf16.msra.mxu1 %v543_v7 }
 0x192   : > { %1214 = vmatmul.mubr.msk.bf16.vlgmr.msra.gmra.mrb[8].mxu1 %vm582_vm9, %v1456_v27 }
 0x24d   : > { %v623_v57 = vpop.f32.mrb[0].mxu1 }
 0x24e   : > { %v624_v9 = vadd.f32 %v623_v57, %v2425_v55  ;;  %v625_v14 = vpop.f32.mrb[1].mxu1 }
 0x24f   : > { %v626_v15 = vadd.f32 %v625_v14, %v2425_v55  ;;  %v627_v16 = vpop.f32.mrb[2].mxu1 }
 0x250   : > { %v691_v20 = vadd.f32 %v624_v9, %v2180_v18  ;;  %v628_v25 = vadd.f32 %v627_v16, %v2427_v13  ;;  %v629_v26 = vpop.f32.mrb[3].mxu1 }
 0x251   : > { %v2434_v37 = vadd.f32 %v626_v15, %v2218_v33  ;;  %v630_v38 = vadd.f32 %v629_v26, %v2427_v13 }
 0x252   : > { %vm703_vm10 = vcmp.ge.f32.partialorder %v691_v20, 0.0  ;;  %v715_v39 = vmul.f32 0.1, %v691_v20  ;;  %v694_v40 = vadd.f32 %v628_v25, %v2184_v19 }
 0x253   : > { %v2439_v41 = vadd.f32 %v630_v38, %v2237_v42  ;;  %vm704_vm11 = vcmp.ge.f32.partialorder %v2434_v37, 0.0  ;;  %v716_v18 = vmul.f32 0.1, %v2434_v37 }
 0x254   : > { %vm706_vm13 = vcmp.ge.f32.partialorder %v694_v40, 0.0  ;;  %v718_v44 = vmul.f32 0.1, %v694_v40  ;;  %v2443_v45 = vsel %vm703_vm10, %v691_v20, %v715_v39  ;;  %vm1162_vm10 = vmpackc.low %vm2196_vm12, %vm2196_vm12 }
 0x255   : > { %v633_v33 = vpop.f32.mrb[4].mxu1  ;;  %vm707_vm14 = vcmp.ge.f32.partialorder %v2439_v41, 0.0  ;;  %v719_v51 = vmul.f32 0.1, %v2439_v41  ;;  %v2448_v19 = vsel %vm704_vm11, %v2434_v37, %v716_v18  ;;  %v739_v1 = vsel %vm2154_vm2, %v2443_v45, 0.0  ;;  %vm1165_vm11 = vmpackc.low %vm2154_vm2, %vm2154_vm2 }
 0x256   : > { %v635_v42 = vpop.f32.mrb[5].mxu1  ;;  %v2450_v52 = vsel %vm706_vm13, %v694_v40, %v718_v44  ;;  %v634_v54 = vadd.f32 %v633_v33, %v565_v43  ;;  %v740_v58 = vsel %vm2196_vm12, %v2448_v19, 0.0  ;;  %vm808_vm13 = vcmp.lt.s32.totalorder %v2149_v2, 125 }
 0x257   : > { %v637_v59 = vpop.f32.mrb[6].mxu1  ;;  %v742_v60 = vsel %vm2154_vm2, %v2450_v52, 0.0  ;;  %v1166_v34 = vpack.c.bf16 %v2450_v52, %v2443_v45  ;;  %v636_v35 = vadd.f32 %v635_v42, %v565_v43  ;;  %v2464_v62 = vsel %vm707_vm14, %v2439_v41, %v719_v51 }
 0x258   : > { %v2466_v63 = vpack.i.bf16 %v742_v60, %v739_v1  ;;  %v697_v3 = vadd.f32 %v634_v54, %v2162_v11  ;;  %v638_v4 = vadd.f32 %v637_v59, %v570_v53  ;;  %v639_v22 = vpop.f32.mrb[7].mxu1  ;;  %v743_v23 = vsel %vm2196_vm12, %v2464_v62, 0.0 }
 0x259   : > { %v2473_v5 = vadd.f32 %v636_v35, %v2256_v50  ;;  %v640_v61 = vadd.f32 %v639_v22, %v570_v53  ;;  %v1163_v0 = vpack.c.bf16 %v2464_v62, %v2448_v19  ;;  %v1400_v10 = vpack.i.bf16 %v743_v23, %v740_v58  ;;  %v833_v22 = vld [vmem:[%s2783_s9] sm:$0xff] }
 0x25a   : > { %1396 = vrot.lane.b32.xlu1 %v2466_v63, %s1747_s7  ;;  %v721_v21 = vmul.f32 0.1, %v697_v3  ;;  %v700_v11 = vadd.f32 %v638_v4, %v2166_v12  ;;  %vm709_vm15 = vcmp.ge.f32.partialorder %v697_v3, 0.0  ;;  %v836_v4 = vld [vmem:[%s2783_s9 + $0x18] sm:$0xff] }
 0x25b   : > { %v2481_v28 = vadd.f32 %v640_v61, %v2273_v56  ;;  %1401 = vrot.lane.b32.xlu0 %v1400_v10, %s1747_s7  ;;  %vm710_vm0 = vcmp.ge.f32.partialorder %v2473_v5, 0.0  ;;  %v722_v50 = vmul.f32 0.1, %v2473_v5 }
 0x25c   : > { %v724_v27 = vmul.f32 0.1, %v700_v11  ;;  %vm712_vm1 = vcmp.ge.f32.partialorder %v700_v11, 0.0  ;;  %v2486_v30 = vsel %vm709_vm15, %v697_v3, %v721_v21 }
 0x25d   : > { %v745_v32 = vsel %vm2154_vm2, %v2486_v30, 0.0  ;;  %vm713_vm3 = vcmp.ge.f32.partialorder %v2481_v28, 0.0  ;;  %v725_v12 = vmul.f32 0.1, %v2481_v28  ;;  %v2494_v56 = vsel %vm710_vm0, %v2473_v5, %v722_v50 }
 0x25e   : > { %v2496_v36 = vsel %vm712_vm1, %v700_v11, %v724_v27  ;;  %v746_v60 = vsel %vm2196_vm12, %v2494_v56, 0.0 }
 0x25f   : > { %v748_v46 = vsel %vm2154_vm2, %v2496_v36, 0.0  ;;  %v1172_v47 = vpack.c.bf16 %v2496_v36, %v2486_v30  ;;  %v2504_v7 = vsel %vm713_vm3, %v2481_v28, %v725_v12  ;;  %v1457_v36 = vld [vmem:[%s2784_s12] sm:$0xff]  }
 0x260   : > { %v1405_v57 = vpack.i.bf16 %v748_v46, %v745_v32  ;;  %v1169_v9 = vpack.c.bf16 %v2504_v7, %v2494_v56  ;;  %v749_v35 = vsel %vm2196_vm12, %v2504_v7, 0.0 }
 0x261   : > { %v1415_v3 = vpack.i.bf16 %v749_v35, %v746_v60 }
 0x262   : > { %1406 = vrot.lane.b32.xlu0 %v1405_v57, %s1747_s7 }
 0x265   : > { %v1215_v14 = vpop.f32.mrb[8].mxu1 }
 0x266   : > { %v685_v15 = vadd.f32 %v1215_v14, %v565_v43  ;;  %v676_v16 = vpop.f32.mrb[9].mxu1 }
 0x267   : > { %v677_v20 = vadd.f32 %v676_v16, %v2425_v55  ;;  %v1216_v25 = vpop.f32.mrb[10].mxu1 }
 0x268   : > { %v699_v26 = vadd.f32 %v685_v15, %v2248_v48  ;;  %v688_v38 = vadd.f32 %v1216_v25, %v570_v53  ;;  %v679_v39 = vpop.f32.mrb[11].mxu1 }
 0x269   : > { %v693_v40 = vadd.f32 %v677_v20, %v2207_v29  ;;  %v680_v18 = vadd.f32 %v679_v39, %v2427_v13 }
 0x26a   : > { %vm711_vm4 = vcmp.ge.f32.partialorder %v699_v26, 0.0  ;;  %v723_v44 = vmul.f32 0.1, %v699_v26  ;;  %v702_v33 = vadd.f32 %v688_v38, %v2252_v49 }
 0x26b   : > { %vm705_vm5 = vcmp.ge.f32.partialorder %v693_v40, 0.0  ;;  %v717_v51 = vmul.f32 0.1, %v693_v40  ;;  %v696_v43 = vadd.f32 %v680_v18, %v2212_v31 }
 0x26c   : > { %vm714_vm6 = vcmp.ge.f32.partialorder %v702_v33, 0.0  ;;  %v726_v42 = vmul.f32 0.1, %v702_v33  ;;  %v735_v55 = vsel %vm711_vm4, %v699_v26, %v723_v44 }
 0x26d   : > { %vm708_vm8 = vcmp.ge.f32.partialorder %v696_v43, 0.0  ;;  %v720_v1 = vmul.f32 0.1, %v696_v43  ;;  %v729_v48 = vsel %vm705_vm5, %v693_v40, %v717_v51  ;;  %v747_v29 = vsel %vm2174_vm7, %v735_v55, 0.0 }
 0x26e   : > { %v738_v53 = vsel %vm714_vm6, %v702_v33, %v726_v42  ;;  %v741_v49 = vsel %vm2174_vm7, %v729_v48, 0.0 }
 0x26f   : > { %v750_v13 = vsel %vm2174_vm7, %v738_v53, 0.0  ;;  %v732_v54 = vsel %vm708_vm8, %v696_v43, %v720_v1 }
 0x270   : > { %v1420_v58 = vpack.i.bf16 %v750_v13, %v747_v29  ;;  %v744_v31 = vsel %vm2174_vm7, %v732_v54, 0.0  ;;  %vm775_vm7 = vcmp.lt.s32.totalorder %v2149_v2, 3  ;;  %v1458_v2 = vld [vmem:[%s2784_s12 + $0x8] sm:$0xff]  }
 0x271   : > { %v1410_v59 = vpack.i.bf16 %v744_v31, %v741_v49 }
 0x272   : > { %1421 = vrot.lane.b32.xlu0 %v1420_v58, %s1747_s7 }
 0x273   : > { %1411 = vrot.lane.b32.xlu1 %v1410_v59, %s1747_s7 }
 0x276   : > { %1436 = vrot.lane.b32.xlu0 %v1410_v59, %s1748_s6 }
 0x277   : > { %1416 = vrot.lane.b32.xlu1 %v1415_v3, %s1747_s7  ;;  %s2787_s7 = sld [smem:[#allocation31_spill]] }
 0x27a   : > { %1441 = vrot.lane.b32.xlu0 %v1415_v3, %s1748_s6 }
 0x27b   : > { %1426 = vrot.lane.b32.xlu1 %v1400_v10, %s1748_s6 }
 0x27d   : > { %s2637_s21 = scalar_lea.hbm %s2787_s7, %s1177_s5 }
 0x27e   : > { %1451 = vrot.lane.b32.xlu0 %v1405_v57, %s1748_s6 }
 0x27f   : > { %1431 = vrot.lane.b32.xlu1 %v2466_v63, %s1748_s6  ;;  %v835_v63 = vld [vmem:[%s2783_s9 + $0x10] sm:$0xff] }
 0x282   : > { %844 = vperm.xlu0 %1393, %v834_v17  }
 0x283   : > { %1446 = vrot.lane.b32.xlu1 %v1420_v58, %s1748_s6  ;;  %s2646_s6 = scalar_lea.sflag [#allocation5], %s2788_s30 }
 0x286   : > { %854 = vperm.xlu0 %1393, %v836_v4  }
 0x287   : > { %839 = vperm.xlu1 %1394, %v833_v22  }
 0x28b   : > { %849 = vperm.xlu1 %1394, %v835_v63  }
 0x2cc   : > { %v1397_v23 = vpop.permute.xlu1 %1396 }
 0x2cd   : > { %v1399_v61 = vunpack.i.h.bf16 %v1397_v23  ;;  %v1398_v10 = vunpack.i.l.bf16 %v1397_v23  ;;  %v1402_v21 = vpop.permute.xlu0 %1401 }
 0x2ce   : > { %v1404_v11 = vunpack.i.h.bf16 %v1402_v21  ;;  %v1403_v50 = vunpack.i.l.bf16 %v1402_v21 }
 0x2d0   : > { %v776_v27 = vsel %vm775_vm7, %v1398_v10, %v1403_v50  ;;  %v777_v32 = vsel %vm775_vm7, %v1399_v61, %v1404_v11 }
 0x2d1   : > { %v818_v12 = vpack.c.bf16 %v777_v32, %v776_v27 }
 0x2d3   : > { %873 = vmatprep.subr.bf16.mxu0 %v818_v12 }
 0x2d4   : > { %v1407_v46 = vpop.permute.xlu0 %1406 }
 0x2d5   : > { %v1409_v40 = vunpack.i.h.bf16 %v1407_v46  ;;  %v1408_v18 = vunpack.i.l.bf16 %v1407_v46 }
 0x2e4   : > { %v1422_v57 = vpop.permute.xlu0 %1421 }
 0x2e5   : > { %v1412_v14 = vpop.permute.xlu1 %1411  ;;  %v1424_v20 = vunpack.i.h.bf16 %v1422_v57  ;;  %v1423_v25 = vunpack.i.l.bf16 %v1422_v57 }
 0x2e6   : > { %v1414_v15 = vunpack.i.h.bf16 %v1412_v14  ;;  %v1413_v16 = vunpack.i.l.bf16 %v1412_v14 }
 0x2e7   : > { %v782_v42 = vsel %vm775_vm7, %v1423_v25, %v1408_v18  ;;  %v783_v55 = vsel %vm775_vm7, %v1424_v20, %v1409_v40 }
 0x2e8   : > { %v1437_v26 = vpop.permute.xlu0 %1436  ;;  %v780_v38 = vsel %vm775_vm7, %v1413_v16, %v1398_v10  ;;  %v781_v39 = vsel %vm775_vm7, %v1414_v15, %v1399_v61  ;;  %v819_v54 = vpack.c.bf16 %v783_v55, %v782_v42 }
 0x2e9   : > { %v1417_v44 = vpop.permute.xlu1 %1416  ;;  %v817_v33 = vpack.c.bf16 %v781_v39, %v780_v38  ;;  %v1439_v59 = vunpack.i.h.bf16 %v1437_v26  ;;  %v1438_v60 = vunpack.i.l.bf16 %v1437_v26 }
 0x2ea   : > { %v1419_v51 = vunpack.i.h.bf16 %v1417_v44  ;;  %v1418_v43 = vunpack.i.l.bf16 %v1417_v44 }
 0x2eb   : > { %874 = vmatpush1.bf16.msra.mxu0 %v817_v33 }
 0x2ec   : > { %v778_v1 = vsel %vm775_vm7, %v1408_v18, %v1418_v43  ;;  %v779_v48 = vsel %vm775_vm7, %v1409_v40, %v1419_v51  ;;  %v1442_v53 = vpop.permute.xlu0 %1441 }
 0x2ed   : > { %v1427_v29 = vpop.permute.xlu1 %1426  ;;  %v820_v13 = vpack.c.bf16 %v779_v48, %v778_v1  ;;  %v1443_v45 = vunpack.i.l.bf16 %v1442_v53 }
 0x2ee   : > { %v1429_v58 = vunpack.i.h.bf16 %v1427_v29  ;;  %v1428_v49 = vunpack.i.l.bf16 %v1427_v29 }
 0x2ef   : > { %875 = vmatprep.subr.bf16.mxu0 %v820_v13 }
 0x2f0   : > { %876 = vmatpush1.bf16.msra.mxu0 %v819_v54  ;;  %v1452_v35 = vpop.permute.xlu0 %1451  ;;  %v809_v19 = vsel %vm808_vm13, %v1428_v49, %v1438_v60  ;;  %v810_v62 = vsel %vm808_vm13, %v1429_v58, %v1439_v59 }
 0x2f1   : > { %v1432_v31 = vpop.permute.xlu1 %1431  ;;  %1164 = vmatprep.subr.msk.bf16.mxu0 %vm1162_vm10, %v1163_v0  ;;  %v1444_v0 = vunpack.i.h.bf16 %v1442_v53  ;;  %v1454_v52 = vunpack.i.h.bf16 %v1452_v35  ;;  %v1453_v63 = vunpack.i.l.bf16 %v1452_v35  ;;  %v826_v23 = vpack.c.bf16 %v810_v62, %v809_v19 }
 0x2f2   : > { %v1434_v3 = vunpack.i.h.bf16 %v1432_v31  ;;  %v1433_v17 = vunpack.i.l.bf16 %v1432_v31 }
 0x2f3   : > { %v815_v21 = vsel %vm808_vm13, %v1453_v63, %v1443_v45  ;;  %v816_v30 = vsel %vm808_vm13, %v1454_v52, %v1444_v0 }
 0x2f4   : > { %1167 = vmatpush1.bf16.msk.msra.mxu0 %vm1165_vm11, %v1166_v34  ;;  %v813_v61 = vsel %vm808_vm13, %v1433_v17, %v1428_v49  ;;  %v814_v10 = vsel %vm808_vm13, %v1434_v3, %v1429_v58  ;;  %v827_v8 = vpack.c.bf16 %v816_v30, %v815_v21 }
 0x2f5   : > { %v1447_v4 = vpop.permute.xlu1 %1446  ;;  %1170 = vmatprep.subr.msk.bf16.mxu0 %vm1162_vm10, %v1169_v9  ;;  %v825_v7 = vpack.c.bf16 %v814_v10, %v813_v61 }
 0x2f6   : > { %v1449_v34 = vunpack.i.h.bf16 %v1447_v4  ;;  %v1448_v22 = vunpack.i.l.bf16 %v1447_v4 }
 0x2f8   : > { %1173 = vmatpush1.bf16.msk.msra.mxu0 %vm1165_vm11, %v1172_v47  ;;  %v811_v24 = vsel %vm808_vm13, %v1443_v45, %v1448_v22  ;;  %v812_v56 = vsel %vm808_vm13, %v1444_v0, %v1449_v34 }
 0x2f9   : > { %881 = vmatprep.subr.bf16.mxu0 %v826_v23  ;;  %v828_v9 = vpack.c.bf16 %v812_v56, %v811_v24 }
 0x2fc   : > { %882 = vmatpush1.bf16.msra.mxu0 %v825_v7 }
 0x2fd   : > { %883 = vmatprep.subr.bf16.mxu0 %v828_v9 }
 0x300   : > { %884 = vmatpush1.bf16.msra.mxu0 %v827_v8 }
 0x301   : > { %v845_v12 = vpop.permute.xlu0 %844 }
 0x303   : > { %1174 = vmatmul.mubr.msk.bf16.vlgmr.msra.gmra.mrb[0].mxu0 %vm582_vm9, %v1457_v36 }
 0x304   : > { %913 = vmatprep.mubr.bf16.mxu0 %v1746_v6 }
 0x305   : > { %v855_v38 = vpop.permute.xlu0 %854 }
 0x306   : > { %v840_v11 = vpop.permute.xlu1 %839 }
 0x30a   : > { %v850_v16 = vpop.permute.xlu1 %849 }
 0x30b   : > { %1175 = vmatmul.mubr.msk.bf16.gmra.mrb[4].mxu0 %vm582_vm9, %v1458_v2 }
 0x3d6   : > { %v907_v47 = vpop.f32.mrb[0].mxu0 }
 0x3d7   : > { %v908_v50 = vpop.f32.mrb[1].mxu0 }
 0x3d8   : > { %v909_v27 = vadd.f32 %v908_v50, %v840_v11  ;;  %v910_v32 = vpop.f32.mrb[2].mxu0 }
 0x3d9   : > { %v911_v46 = vpop.f32.mrb[3].mxu0 }
 0x3da   : > { %v922_v57 = vadd.f32 %v909_v27, %v2434_v37  ;;  %v912_v14 = vadd.f32 %v911_v46, %v845_v12 }
 0x3dc   : > { %926 = vst [vmem:[%s2131_s16] sm:$0xff] %v922_v57  ;;  %v923_v6 = vadd.f32 %v912_v14, %v2439_v41 }
 0x3de   : > { %927 = vst [vmem:[%s2131_s16 + $0x8] sm:$0xff] %v923_v6  ;;  %v915_v15 = vpop.f32.mrb[4].mxu0 }
 0x3df   : > { %v916_v20 = vpop.f32.mrb[5].mxu0 }
 0x3e0   : > { %v917_v25 = vadd.f32 %v916_v20, %v850_v16  ;;  %v918_v26 = vpop.f32.mrb[6].mxu0 }
 0x3e1   : > { %v919_v39 = vpop.f32.mrb[7].mxu0 }
 0x3e2   : > { %v924_v37 = vadd.f32 %v917_v25, %v2473_v5  ;;  %v920_v40 = vadd.f32 %v919_v39, %v855_v38 }
 0x3e4   : > { %928 = vst [vmem:[%s2131_s16 + $0x10] sm:$0xff] %v924_v37  ;;  %v925_v41 = vadd.f32 %v920_v40, %v2481_v28 }
 0x3e6   : > { %929 = vst [vmem:[%s2131_s16 + $0x18] sm:$0xff] %v925_v41 }
 0x3e7   : > { %1648 = shalt.err (!%p1645_p10)
}
 0x3e8   : > { %s1649_s16 = scalar_lea.hbm %s2637_s21, 512  ;;  %s1653_s28 = scalar_lea.hbm %s2787_s7, 3072 }
 0x3e9   : > { %p1650_p0 = scmp.ne.s32.totalorder %s2637_s21, %s1649_s16  ;;  %p1654_p7 = scmp.lt.u32.totalorder %s2637_s21, %s2787_s7 }
 0x3ea   : > { %p1655_p6 = scmp.lt.u32.totalorder %s1653_s28, %s1649_s16  ;;  %p1657_p9 = scmp.lt.u32.totalorder %s1649_s16, %s2637_s21 }
 0x3eb   : > { %p1651_p5 = pnand %p1650_p0, %p2789_p2 }
 0x3ec   : > { %p1656_p12 = por %p1655_p6, %p1654_p7 }
 0x3ed   : > { %p1652_p13 = pneg %p1651_p5 }
 0x3ee   : > { %p1658_p3 = por %p1657_p9, %p1656_p12 }
 0x3f0   : > { %p1659_p1 = pnand %p1658_p3, %p1652_p13 }
 0x3f2   : > { %1662 = shalt.err (!%p1659_p1)
}
 0x3f3   : > { %s1750_s23 = smov 128  }
 0x3f4   : > { %1230 = dma.vmem_to_hbm [thread:$0]  (%p2789_p2), %s2641_s26, 512, %s2637_s21, %s2646_s6, %s1750_s23, %s1742_s14, %s1743_s17  }
 0x3f5 PF: > { %s2790_s3 = sld [smem:[#allocation21_spill]]  ;;  %s2791_s25 = sld [smem:[#allocation16_spill]] }
 0x3f6   : > { %s2792_s20 = sld [smem:[#allocation25_spill]] }
 0x3fb   : > { %p1260_p4 = scmp.ge.s32.totalorder %s2790_s3, 2  ;;  %s960_s1 = sand.u32 1, %s2791_s25  }
 0x3fc   : > { %p2793_p8 = scmp.ne.s32.totalorder %s2792_s20, 0  ;;  %s961_s5 = scalar_lea.sflag [#allocation5], %s960_s1 }
 0x3fe   : > { %p1249_p11 = pnand %p1260_p4, %p2793_p8 }
 0x400   : > { %1706 = dma.done.wait (!%p1249_p11), %s961_s5, 512  }
 0x401   : > { %1708 = vsyncadd (!%p1249_p11), %s961_s5, 4294966784  ;;  %s18_s25 = sadd.s32 1, %s2790_s3   ;;  %s2794_s18 = sld [smem:[#allocation17_spill]] }
 0x402   : > { %p15_p10 = scmp.ge.s32.totalorder %s18_s25, 8   ;;  %s2795_s19 = sld [smem:[#allocation18_spill]] }
 0x403   : > { %s2796_s20 = sld [smem:[#allocation26_spill]]  ;;  %s2797_s21 = sld [smem:[#allocation19_spill]] }
 0x404   : > { %s2798_s22 = sld [smem:[#allocation20_spill]]  ;;  %s2799_s23 = sld [smem:[#allocation22_spill]] }
 0x405   : > { %s2800_s24 = sld [smem:[#allocation24_spill]]  ;;  %17 = sbr.rel (!%p15_p10) target bundleno = 11 (0xb), region = 127 }
 0x40c   :  { %966 = vsyncpa [#allocation5], 1 }
 0x40d   :  { %968 = vsyncpa [#allocation5 + $0x1], 1 }
 0x40e   :  { %969 = vsyncmov [#allocation3] }
 0x411   :  { %s970_s14 = vpop.sfrf %969 }
 0x412   :  { %p1180_p2 = scmp.ne.s32.totalorder %s970_s14, 0 }
 0x414   :  { %974 = shalt.err (%p1180_p2)  }
 0x415   :  { %976 = vsyncmov [#allocation3 + $0x1] }
 0x418   :  { %s977_s17 = vpop.sfrf %976 }
 0x419   :  { %p1181_p0 = scmp.ne.s32.totalorder %s977_s17, 0 }
 0x41b   :  { %981 = shalt.err (%p1181_p0)  }
 0x41c   :  { %983 = vsyncmov [#allocation3 + $0x2] }
 0x41f   :  { %s984_s26 = vpop.sfrf %983 }
 0x420   :  { %p1182_p5 = scmp.ne.s32.totalorder %s984_s26, 0 }
 0x422   :  { %988 = shalt.err (%p1182_p5)  }
 0x423   :  { %990 = vsyncmov [#allocation3 + $0x3] }
 0x426   :  { %s991_s4 = vpop.sfrf %990 }
 0x427   :  { %p1183_p13 = scmp.ne.s32.totalorder %s991_s4, 0 }
 0x429   :  { %995 = shalt.err (%p1183_p13)  }
 0x42a   :  { %997 = vsyncmov [#allocation3 + $0x4] }
 0x42d   :  { %s998_s30 = vpop.sfrf %997 }
 0x42e   :  { %p1184_p7 = scmp.ne.s32.totalorder %s998_s30, 0 }
 0x430   :  { %1002 = shalt.err (%p1184_p7)  }
 0x431   :  { %1004 = vsyncmov [#allocation3 + $0x5] }
 0x434   :  { %s1005_s0 = vpop.sfrf %1004 }
 0x435   :  { %p1185_p6 = scmp.ne.s32.totalorder %s1005_s0, 0 }
 0x437   :  { %1009 = shalt.err (%p1185_p6)  }

</bundles_post_ra>
